<compile_context>
chip_gen: v7x
topology: tpu7x:2x2x1
jax: 0.10.0
libtpu: 0.0.40
codegen_flags: <defaults>
</compile_context>

<pallas_src>
import math

import jax
import jax.numpy as jnp
from jax import lax
from jax.experimental import pallas as pl
from jax.experimental.pallas import tpu as pltpu

# ----------------------- small config -----------------------
BATCH = 2
SEQ = 16
HIDDEN = 128
NUM_HEADS = 4
HEAD_DIM = HIDDEN // NUM_HEADS          # 32
HALF = HEAD_DIM // 2                    # 16
INTERMEDIATE = 256
ROPE_THETA = 10000.0
RMS_EPS = 1e-6
NEG_INF = -1e9


# ----------------------- Pallas kernel -----------------------
def decoder_layer_kernel(x_ref, cos_ref, sina_ref, sinb_ref, mask_ref,
                         g1_ref, wqkv_ref, wo_ref, g2_ref, wgu_ref, wd_ref,
                         out_ref):
    x = x_ref[...]                                        # (M, HID) f32, M = B*S
    M, HID = x.shape

    def rmsnorm(h, gamma):
        var = jnp.mean(h * h, axis=-1, keepdims=True)
        return gamma * (h * lax.rsqrt(var + RMS_EPS))

    # ---- input RMSNorm ----
    h = rmsnorm(x, g1_ref[...])

    # ---- fused Q|K|V projection (bf16 operands, f32 accumulation on MXU) ----
    qkv = jnp.dot(h.astype(jnp.bfloat16), wqkv_ref[...],
                  preferred_element_type=jnp.float32)     # (M, 3*HID)
    q = qkv[:, :HID]                  # 1/sqrt(D) already folded into these columns
    k = qkv[:, HID:2 * HID]
    v = qkv[:, 2 * HID:]

    # ---- RoPE in lane-dense (M, HID) layout ----
    # rotate_half within each head == lane roll by ±HALF; the head-boundary
    # selection and the minus sign are baked into the precomputed sin_a / sin_b.
    cos = cos_ref[...]
    sin_a = sina_ref[...]
    sin_b = sinb_ref[...]

    def rope(t):
        return (t * cos
                + pltpu.roll(t, HID - HALF, axis=1) * sin_a   # brings t[p+HALF] to p
                + pltpu.roll(t, HALF, axis=1) * sin_b)        # brings t[p-HALF] to p

    q = rope(q)
    k = rope(k)

    # ---- attention: per-head (unrolled), batch handled by block-diag causal mask ----
    mask = mask_ref[...]                                  # (M, M) additive
    ctx_parts = []
    for hh in range(NUM_HEADS):
        lo = hh * HEAD_DIM
        qh = q[:, lo:lo + HEAD_DIM]                       # (M, D)
        kh = k[:, lo:lo + HEAD_DIM]
        vh = v[:, lo:lo + HEAD_DIM]
        s = lax.dot_general(qh, kh, (((1,), (1,)), ((), ())),
                            preferred_element_type=jnp.float32)   # q @ k^T -> (M, M)
        s = s + mask
        m = jnp.max(s, axis=-1, keepdims=True)
        p = jnp.exp(s - m)
        l = jnp.sum(p, axis=-1, keepdims=True)
        o = jnp.dot(p, vh, preferred_element_type=jnp.float32)    # (M, D)
        ctx_parts.append(o * pl.reciprocal(l, approx=True))       # normalize on EUP
    ctx = jnp.concatenate(ctx_parts, axis=-1)                     # (M, HID)
    # attention_dropout = 0.0 -> no-op

    attn_out = jnp.dot(ctx.astype(jnp.bfloat16), wo_ref[...],
                       preferred_element_type=jnp.float32)

    # ---- residual + post-attention RMSNorm ----
    x2 = x + attn_out
    h2 = rmsnorm(x2, g2_ref[...])

    # ---- SwiGLU MLP with fused gate|up matmul ----
    gu = jnp.dot(h2.astype(jnp.bfloat16), wgu_ref[...],
                 preferred_element_type=jnp.float32)              # (M, 2*INTER)
    gate = gu[:, :INTERMEDIATE]
    up = gu[:, INTERMEDIATE:]
    act = gate * jax.nn.sigmoid(gate) * up                        # SiLU(gate) * up
    down = jnp.dot(act.astype(jnp.bfloat16), wd_ref[...],
                   preferred_element_type=jnp.float32)

    out_ref[...] = x2 + down


# ----------------------- wrapper -----------------------
def llama_decoder_layer(x, cos, sin, params):
    B, S, HID = x.shape
    M = B * S
    H, D = NUM_HEADS, HEAD_DIM

    x_flat = x.reshape(M, HID)

    # Fused weights for the MXU (bf16 operands, f32 accumulation in-kernel).
    # 1/sqrt(head_dim) is folded into the Q columns (RoPE is linear, so this commutes).
    scale = 1.0 / math.sqrt(D)
    wqkv = jnp.concatenate([params["wq"] * scale, params["wk"], params["wv"]],
                           axis=1).astype(jnp.bfloat16)           # (HID, 3*HID)
    wgu = jnp.concatenate([params["wg"], params["wu"]],
                          axis=1).astype(jnp.bfloat16)            # (HID, 2*INTER)
    wo = params["wo"].astype(jnp.bfloat16)
    wd = params["wd"].astype(jnp.bfloat16)

    # Lane-dense RoPE tables, tiled over heads: cos_d[m, h*D+d] = cos[m, d].
    cos_d = jnp.tile(cos.reshape(M, D), (1, H)).astype(jnp.float32)
    sin_d = jnp.tile(sin.reshape(M, D), (1, H)).astype(jnp.float32)
    lane = jnp.arange(HID) % D
    first_half = (lane < HALF)[None, :]
    sin_a = jnp.where(first_half, -sin_d, 0.0).astype(jnp.float32)   # pairs with roll(+HALF ahead)
    sin_b = jnp.where(first_half, 0.0, sin_d).astype(jnp.float32)    # pairs with roll(HALF behind)

    # Block-diagonal causal additive mask over the flattened batch*seq axis.
    r = jnp.arange(M)[:, None]
    c = jnp.arange(M)[None, :]
    mask = jnp.where((r // S == c // S) & (c <= r), 0.0, NEG_INF).astype(jnp.float32)

    # The whole working set (~0.4 MiB) fits in VMEM on every TPU generation, so the
    # kernel is a single grid-less pallas_call: every operand is one full VMEM block.
    out_flat = pl.pallas_call(
        decoder_layer_kernel,
        out_shape=jax.ShapeDtypeStruct((M, HID), jnp.float32),
    )(x_flat, cos_d, sin_a, sin_b, mask,
      params["g1"], wqkv, wo, params["g2"], wgu, wd)

    return out_flat.reshape(B, S, HID)


# ----------------------- pure-JAX reference -----------------------
def reference(x, cos, sin, mask, params):
    def rmsnorm(h, g):
        var = jnp.mean(h * h, axis=-1, keepdims=True)
        return g * (h * lax.rsqrt(var + RMS_EPS))

    def rotate_half(t):
        d = t.shape[-1]
        return jnp.concatenate([-t[..., d // 2:], t[..., : d // 2]], axis=-1)

    B, S, HID = x.shape
    H, D = NUM_HEADS, HEAD_DIM
    h = rmsnorm(x, params["g1"][0])
    q = (h @ params["wq"]).reshape(B, S, H, D).transpose(0, 2, 1, 3)
    k = (h @ params["wk"]).reshape(B, S, H, D).transpose(0, 2, 1, 3)
    v = (h @ params["wv"]).reshape(B, S, H, D).transpose(0, 2, 1, 3)
    c = cos[:, None, :, :]
    s = sin[:, None, :, :]
    q = q * c + rotate_half(q) * s
    k = k * c + rotate_half(k) * s
    scores = jnp.einsum('bhqd,bhkd->bhqk', q, k) / math.sqrt(D) + mask
    attn = jax.nn.softmax(scores, axis=-1)
    ctx = jnp.einsum('bhqk,bhkd->bhqd', attn, v).transpose(0, 2, 1, 3).reshape(B, S, HID)
    x2 = x + ctx @ params["wo"]
    h2 = rmsnorm(x2, params["g2"])
    gate = h2 @ params["wg"]
    up = h2 @ params["wu"]
    return x2 + (gate * jax.nn.sigmoid(gate) * up) @ params["wd"]


# ----------------------- setup & run -----------------------
if __name__ == "__main__":
    key = jax.random.PRNGKey(0)
    ks = jax.random.split(key, 10)

    def init(k, shape, scale=0.02):
        return (scale * jax.random.normal(k, shape)).astype(jnp.float32)

    params = {
        "g1": jnp.ones((1, HIDDEN), jnp.float32),
        "g2": jnp.ones((1, HIDDEN), jnp.float32),
        # weights stored (in, out): equivalent to nn.Linear weight.T
        "wq": init(ks[0], (HIDDEN, HIDDEN)),
        "wk": init(ks[1], (HIDDEN, HIDDEN)),
        "wv": init(ks[2], (HIDDEN, HIDDEN)),
        "wo": init(ks[3], (HIDDEN, HIDDEN)),
        "wg": init(ks[4], (HIDDEN, INTERMEDIATE)),
        "wu": init(ks[5], (HIDDEN, INTERMEDIATE)),
        "wd": init(ks[6], (INTERMEDIATE, HIDDEN)),
    }

    x = jax.random.normal(ks[7], (BATCH, SEQ, HIDDEN), jnp.float32)

    # rotary cos/sin (plain-JAX trig glue, matches LlamaRotaryPositionEmbedding)
    position_ids = jnp.broadcast_to(jnp.arange(SEQ, dtype=jnp.float32), (BATCH, SEQ))
    inv_freq = 1.0 / (ROPE_THETA ** (jnp.arange(0, HEAD_DIM, 2, dtype=jnp.float32) / HEAD_DIM))
    freqs = position_ids[:, :, None] * inv_freq[None, None, :]        # (B, S, D/2)
    emb = jnp.concatenate([freqs, freqs], axis=-1)                    # (B, S, D)
    cos = jnp.cos(emb).astype(jnp.float32)
    sin = jnp.sin(emb).astype(jnp.float32)

    # additive causal mask (B, 1, S, S) — used by the reference only; the kernel
    # builds an equivalent block-diagonal mask over the flattened batch*seq axis.
    i = jnp.arange(SEQ)[:, None]
    j = jnp.arange(SEQ)[None, :]
    causal = jnp.where(j <= i, 0.0, NEG_INF).astype(jnp.float32)
    mask_ref4d = jnp.broadcast_to(causal, (BATCH, 1, SEQ, SEQ))

    out = llama_decoder_layer(x, cos, sin, params)
    out = jax.block_until_ready(out)

    ref = reference(x, cos, sin, mask_ref4d, params)
    assert out.shape == (BATCH, SEQ, HIDDEN)
    # bf16 matmul operands (f32 accumulation) introduce small drift vs the f32 reference.
    assert jnp.allclose(out, ref, rtol=2e-3, atol=2e-3), \
        f"max abs err {jnp.max(jnp.abs(out - ref))}"

    print("KERNEL_OK")
</pallas_src>

<mosaic_0001>
module attributes {stable_mosaic.version = 11 : i64} {
  func.func @decoder_layer_kernel(%arg0: memref<32x128xf32, #tpu.memory_space<vmem>>, %arg1: memref<32x128xf32, #tpu.memory_space<vmem>>, %arg2: memref<32x128xf32, #tpu.memory_space<vmem>>, %arg3: memref<32x128xf32, #tpu.memory_space<vmem>>, %arg4: memref<32x32xf32, #tpu.memory_space<vmem>>, %arg5: memref<1x128xf32, #tpu.memory_space<vmem>>, %arg6: memref<128x384xbf16, #tpu.memory_space<vmem>>, %arg7: memref<128x128xbf16, #tpu.memory_space<vmem>>, %arg8: memref<1x128xf32, #tpu.memory_space<vmem>>, %arg9: memref<128x512xbf16, #tpu.memory_space<vmem>>, %arg10: memref<256x128xbf16, #tpu.memory_space<vmem>>, %arg11: memref<32x128xf32, #tpu.memory_space<vmem>>) attributes {dimension_semantics = [], scalar_prefetch = 0 : i64, scratch_operands = 0 : i64, tpu.core_type = #tpu.core_type<tc>} {
    %c0 = arith.constant 0 : index
    %c0_0 = arith.constant 0 : index
    %0 = vector.load %arg0[%c0, %c0_0] : memref<32x128xf32, #tpu.memory_space<vmem>>, vector<32x128xf32>
    %c0_1 = arith.constant 0 : index
    %c0_2 = arith.constant 0 : index
    %1 = vector.load %arg5[%c0_1, %c0_2] : memref<1x128xf32, #tpu.memory_space<vmem>>, vector<1x128xf32>
    %2 = arith.mulf %0, %0 : vector<32x128xf32>
    %cst = arith.constant dense<0.000000e+00> : vector<32xf32>
    %3 = vector.multi_reduction <add>, %2, %cst [1] : vector<32x128xf32> to vector<32xf32>
    %4 = vector.shape_cast %3 : vector<32xf32> to vector<32x1xf32>
    %cst_3 = arith.constant 1.280000e+02 : f32
    %5 = vector.broadcast %cst_3 : f32 to vector<32x1xf32>
    %6 = arith.divf %4, %5 : vector<32x1xf32>
    %cst_4 = arith.constant 9.99999997E-7 : f32
    %7 = vector.broadcast %cst_4 : f32 to vector<32x1xf32>
    %8 = arith.addf %6, %7 : vector<32x1xf32>
    %9 = math.rsqrt %8 : vector<32x1xf32>
    %10 = vector.broadcast %9 : vector<32x1xf32> to vector<32x128xf32>
    %11 = arith.mulf %0, %10 : vector<32x128xf32>
    %12 = vector.broadcast %1 : vector<1x128xf32> to vector<32x128xf32>
    %13 = arith.mulf %12, %11 : vector<32x128xf32>
    %14 = arith.truncf %13 : vector<32x128xf32> to vector<32x128xbf16>
    %c0_5 = arith.constant 0 : index
    %c0_6 = arith.constant 0 : index
    %15 = vector.load %arg6[%c0_5, %c0_6] : memref<128x384xbf16, #tpu.memory_space<vmem>>, vector<128x384xbf16>
    %cst_7 = arith.constant dense<0.000000e+00> : vector<32x384xf32>
    %16 = tpu.matmul %14, %15, %cst_7 {dimension_numbers = #tpu.dot_dimension_numbers<[1], [0], [0], [1], [0, 0, 1, 1], [], []>} : vector<32x128xbf16>, vector<128x384xbf16>, vector<32x384xf32> -> vector<32x384xf32>
    %17 = vector.extract_strided_slice %16 {offsets = [0, 0], sizes = [32, 128], strides = [1, 1]} : vector<32x384xf32> to vector<32x128xf32>
    %18 = vector.extract_strided_slice %16 {offsets = [0, 128], sizes = [32, 128], strides = [1, 1]} : vector<32x384xf32> to vector<32x128xf32>
    %19 = vector.extract_strided_slice %16 {offsets = [0, 256], sizes = [32, 128], strides = [1, 1]} : vector<32x384xf32> to vector<32x128xf32>
    %c0_8 = arith.constant 0 : index
    %c0_9 = arith.constant 0 : index
    %20 = vector.load %arg1[%c0_8, %c0_9] : memref<32x128xf32, #tpu.memory_space<vmem>>, vector<32x128xf32>
    %c0_10 = arith.constant 0 : index
    %c0_11 = arith.constant 0 : index
    %21 = vector.load %arg2[%c0_10, %c0_11] : memref<32x128xf32, #tpu.memory_space<vmem>>, vector<32x128xf32>
    %c0_12 = arith.constant 0 : index
    %c0_13 = arith.constant 0 : index
    %22 = vector.load %arg3[%c0_12, %c0_13] : memref<32x128xf32, #tpu.memory_space<vmem>>, vector<32x128xf32>
    %23 = arith.mulf %17, %20 : vector<32x128xf32>
    %c112_i32 = arith.constant 112 : i32
    %24 = tpu.dynamic_rotate %17 by %c112_i32 dim 1 : vector<32x128xf32>, i32 -> vector<32x128xf32>
    %25 = arith.mulf %24, %21 : vector<32x128xf32>
    %26 = arith.addf %23, %25 : vector<32x128xf32>
    %c16_i32 = arith.constant 16 : i32
    %27 = tpu.dynamic_rotate %17 by %c16_i32 dim 1 : vector<32x128xf32>, i32 -> vector<32x128xf32>
    %28 = arith.mulf %27, %22 : vector<32x128xf32>
    %29 = arith.addf %26, %28 : vector<32x128xf32>
    %30 = arith.mulf %18, %20 : vector<32x128xf32>
    %c112_i32_14 = arith.constant 112 : i32
    %31 = tpu.dynamic_rotate %18 by %c112_i32_14 dim 1 : vector<32x128xf32>, i32 -> vector<32x128xf32>
    %32 = arith.mulf %31, %21 : vector<32x128xf32>
    %33 = arith.addf %30, %32 : vector<32x128xf32>
    %c16_i32_15 = arith.constant 16 : i32
    %34 = tpu.dynamic_rotate %18 by %c16_i32_15 dim 1 : vector<32x128xf32>, i32 -> vector<32x128xf32>
    %35 = arith.mulf %34, %22 : vector<32x128xf32>
    %36 = arith.addf %33, %35 : vector<32x128xf32>
    %c0_16 = arith.constant 0 : index
    %c0_17 = arith.constant 0 : index
    %37 = vector.load %arg4[%c0_16, %c0_17] : memref<32x32xf32, #tpu.memory_space<vmem>>, vector<32x32xf32>
    %38 = vector.extract_strided_slice %29 {offsets = [0, 0], sizes = [32, 32], strides = [1, 1]} : vector<32x128xf32> to vector<32x32xf32>
    %39 = vector.extract_strided_slice %36 {offsets = [0, 0], sizes = [32, 32], strides = [1, 1]} : vector<32x128xf32> to vector<32x32xf32>
    %40 = vector.extract_strided_slice %19 {offsets = [0, 0], sizes = [32, 32], strides = [1, 1]} : vector<32x128xf32> to vector<32x32xf32>
    %cst_18 = arith.constant dense<0.000000e+00> : vector<32x32xf32>
    %41 = tpu.matmul %38, %39, %cst_18 {dimension_numbers = #tpu.dot_dimension_numbers<[1], [1], [0], [0], [0, 0, 1, 0], [], []>} : vector<32x32xf32>, vector<32x32xf32>, vector<32x32xf32> -> vector<32x32xf32>
    %42 = arith.addf %41, %37 : vector<32x32xf32>
    %cst_19 = arith.constant dense<0xFF800000> : vector<32xf32>
    %43 = vector.multi_reduction <maximumf>, %42, %cst_19 [1] : vector<32x32xf32> to vector<32xf32>
    %44 = vector.shape_cast %43 : vector<32xf32> to vector<32x1xf32>
    %45 = vector.broadcast %44 : vector<32x1xf32> to vector<32x32xf32>
    %46 = arith.subf %42, %45 : vector<32x32xf32>
    %47 = math.exp %46 : vector<32x32xf32>
    %cst_20 = arith.constant dense<0.000000e+00> : vector<32xf32>
    %48 = vector.multi_reduction <add>, %47, %cst_20 [1] : vector<32x32xf32> to vector<32xf32>
    %49 = vector.shape_cast %48 : vector<32xf32> to vector<32x1xf32>
    %cst_21 = arith.constant dense<0.000000e+00> : vector<32x32xf32>
    %50 = tpu.matmul %47, %40, %cst_21 {dimension_numbers = #tpu.dot_dimension_numbers<[1], [0], [0], [1], [0, 0, 1, 1], [], []>} : vector<32x32xf32>, vector<32x32xf32>, vector<32x32xf32> -> vector<32x32xf32>
    %51 = tpu.reciprocal %49 {approx = true} : vector<32x1xf32> -> vector<32x1xf32>
    %52 = vector.broadcast %51 : vector<32x1xf32> to vector<32x32xf32>
    %53 = arith.mulf %50, %52 : vector<32x32xf32>
    %54 = vector.extract_strided_slice %29 {offsets = [0, 32], sizes = [32, 32], strides = [1, 1]} : vector<32x128xf32> to vector<32x32xf32>
    %55 = vector.extract_strided_slice %36 {offsets = [0, 32], sizes = [32, 32], strides = [1, 1]} : vector<32x128xf32> to vector<32x32xf32>
    %56 = vector.extract_strided_slice %19 {offsets = [0, 32], sizes = [32, 32], strides = [1, 1]} : vector<32x128xf32> to vector<32x32xf32>
    %cst_22 = arith.constant dense<0.000000e+00> : vector<32x32xf32>
    %57 = tpu.matmul %54, %55, %cst_22 {dimension_numbers = #tpu.dot_dimension_numbers<[1], [1], [0], [0], [0, 0, 1, 0], [], []>} : vector<32x32xf32>, vector<32x32xf32>, vector<32x32xf32> -> vector<32x32xf32>
    %58 = arith.addf %57, %37 : vector<32x32xf32>
    %cst_23 = arith.constant dense<0xFF800000> : vector<32xf32>
    %59 = vector.multi_reduction <maximumf>, %58, %cst_23 [1] : vector<32x32xf32> to vector<32xf32>
    %60 = vector.shape_cast %59 : vector<32xf32> to vector<32x1xf32>
    %61 = vector.broadcast %60 : vector<32x1xf32> to vector<32x32xf32>
    %62 = arith.subf %58, %61 : vector<32x32xf32>
    %63 = math.exp %62 : vector<32x32xf32>
    %cst_24 = arith.constant dense<0.000000e+00> : vector<32xf32>
    %64 = vector.multi_reduction <add>, %63, %cst_24 [1] : vector<32x32xf32> to vector<32xf32>
    %65 = vector.shape_cast %64 : vector<32xf32> to vector<32x1xf32>
    %cst_25 = arith.constant dense<0.000000e+00> : vector<32x32xf32>
    %66 = tpu.matmul %63, %56, %cst_25 {dimension_numbers = #tpu.dot_dimension_numbers<[1], [0], [0], [1], [0, 0, 1, 1], [], []>} : vector<32x32xf32>, vector<32x32xf32>, vector<32x32xf32> -> vector<32x32xf32>
    %67 = tpu.reciprocal %65 {approx = true} : vector<32x1xf32> -> vector<32x1xf32>
    %68 = vector.broadcast %67 : vector<32x1xf32> to vector<32x32xf32>
    %69 = arith.mulf %66, %68 : vector<32x32xf32>
    %70 = vector.extract_strided_slice %29 {offsets = [0, 64], sizes = [32, 32], strides = [1, 1]} : vector<32x128xf32> to vector<32x32xf32>
    %71 = vector.extract_strided_slice %36 {offsets = [0, 64], sizes = [32, 32], strides = [1, 1]} : vector<32x128xf32> to vector<32x32xf32>
    %72 = vector.extract_strided_slice %19 {offsets = [0, 64], sizes = [32, 32], strides = [1, 1]} : vector<32x128xf32> to vector<32x32xf32>
    %cst_26 = arith.constant dense<0.000000e+00> : vector<32x32xf32>
    %73 = tpu.matmul %70, %71, %cst_26 {dimension_numbers = #tpu.dot_dimension_numbers<[1], [1], [0], [0], [0, 0, 1, 0], [], []>} : vector<32x32xf32>, vector<32x32xf32>, vector<32x32xf32> -> vector<32x32xf32>
    %74 = arith.addf %73, %37 : vector<32x32xf32>
    %cst_27 = arith.constant dense<0xFF800000> : vector<32xf32>
    %75 = vector.multi_reduction <maximumf>, %74, %cst_27 [1] : vector<32x32xf32> to vector<32xf32>
    %76 = vector.shape_cast %75 : vector<32xf32> to vector<32x1xf32>
    %77 = vector.broadcast %76 : vector<32x1xf32> to vector<32x32xf32>
    %78 = arith.subf %74, %77 : vector<32x32xf32>
    %79 = math.exp %78 : vector<32x32xf32>
    %cst_28 = arith.constant dense<0.000000e+00> : vector<32xf32>
    %80 = vector.multi_reduction <add>, %79, %cst_28 [1] : vector<32x32xf32> to vector<32xf32>
    %81 = vector.shape_cast %80 : vector<32xf32> to vector<32x1xf32>
    %cst_29 = arith.constant dense<0.000000e+00> : vector<32x32xf32>
    %82 = tpu.matmul %79, %72, %cst_29 {dimension_numbers = #tpu.dot_dimension_numbers<[1], [0], [0], [1], [0, 0, 1, 1], [], []>} : vector<32x32xf32>, vector<32x32xf32>, vector<32x32xf32> -> vector<32x32xf32>
    %83 = tpu.reciprocal %81 {approx = true} : vector<32x1xf32> -> vector<32x1xf32>
    %84 = vector.broadcast %83 : vector<32x1xf32> to vector<32x32xf32>
    %85 = arith.mulf %82, %84 : vector<32x32xf32>
    %86 = vector.extract_strided_slice %29 {offsets = [0, 96], sizes = [32, 32], strides = [1, 1]} : vector<32x128xf32> to vector<32x32xf32>
    %87 = vector.extract_strided_slice %36 {offsets = [0, 96], sizes = [32, 32], strides = [1, 1]} : vector<32x128xf32> to vector<32x32xf32>
    %88 = vector.extract_strided_slice %19 {offsets = [0, 96], sizes = [32, 32], strides = [1, 1]} : vector<32x128xf32> to vector<32x32xf32>
    %cst_30 = arith.constant dense<0.000000e+00> : vector<32x32xf32>
    %89 = tpu.matmul %86, %87, %cst_30 {dimension_numbers = #tpu.dot_dimension_numbers<[1], [1], [0], [0], [0, 0, 1, 0], [], []>} : vector<32x32xf32>, vector<32x32xf32>, vector<32x32xf32> -> vector<32x32xf32>
    %90 = arith.addf %89, %37 : vector<32x32xf32>
    %cst_31 = arith.constant dense<0xFF800000> : vector<32xf32>
    %91 = vector.multi_reduction <maximumf>, %90, %cst_31 [1] : vector<32x32xf32> to vector<32xf32>
    %92 = vector.shape_cast %91 : vector<32xf32> to vector<32x1xf32>
    %93 = vector.broadcast %92 : vector<32x1xf32> to vector<32x32xf32>
    %94 = arith.subf %90, %93 : vector<32x32xf32>
    %95 = math.exp %94 : vector<32x32xf32>
    %cst_32 = arith.constant dense<0.000000e+00> : vector<32xf32>
    %96 = vector.multi_reduction <add>, %95, %cst_32 [1] : vector<32x32xf32> to vector<32xf32>
    %97 = vector.shape_cast %96 : vector<32xf32> to vector<32x1xf32>
    %cst_33 = arith.constant dense<0.000000e+00> : vector<32x32xf32>
    %98 = tpu.matmul %95, %88, %cst_33 {dimension_numbers = #tpu.dot_dimension_numbers<[1], [0], [0], [1], [0, 0, 1, 1], [], []>} : vector<32x32xf32>, vector<32x32xf32>, vector<32x32xf32> -> vector<32x32xf32>
    %99 = tpu.reciprocal %97 {approx = true} : vector<32x1xf32> -> vector<32x1xf32>
    %100 = vector.broadcast %99 : vector<32x1xf32> to vector<32x32xf32>
    %101 = arith.mulf %98, %100 : vector<32x32xf32>
    %102 = tpu.concatenate %53, %69, %85, %101 in 1 : vector<32x32xf32>, vector<32x32xf32>, vector<32x32xf32>, vector<32x32xf32> -> vector<32x128xf32>
    %103 = arith.truncf %102 : vector<32x128xf32> to vector<32x128xbf16>
    %c0_34 = arith.constant 0 : index
    %c0_35 = arith.constant 0 : index
    %104 = vector.load %arg7[%c0_34, %c0_35] : memref<128x128xbf16, #tpu.memory_space<vmem>>, vector<128x128xbf16>
    %cst_36 = arith.constant dense<0.000000e+00> : vector<32x128xf32>
    %105 = tpu.matmul %103, %104, %cst_36 {dimension_numbers = #tpu.dot_dimension_numbers<[1], [0], [0], [1], [0, 0, 1, 1], [], []>} : vector<32x128xbf16>, vector<128x128xbf16>, vector<32x128xf32> -> vector<32x128xf32>
    %106 = arith.addf %0, %105 : vector<32x128xf32>
    %c0_37 = arith.constant 0 : index
    %c0_38 = arith.constant 0 : index
    %107 = vector.load %arg8[%c0_37, %c0_38] : memref<1x128xf32, #tpu.memory_space<vmem>>, vector<1x128xf32>
    %108 = arith.mulf %106, %106 : vector<32x128xf32>
    %cst_39 = arith.constant dense<0.000000e+00> : vector<32xf32>
    %109 = vector.multi_reduction <add>, %108, %cst_39 [1] : vector<32x128xf32> to vector<32xf32>
    %110 = vector.shape_cast %109 : vector<32xf32> to vector<32x1xf32>
    %cst_40 = arith.constant 1.280000e+02 : f32
    %111 = vector.broadcast %cst_40 : f32 to vector<32x1xf32>
    %112 = arith.divf %110, %111 : vector<32x1xf32>
    %cst_41 = arith.constant 9.99999997E-7 : f32
    %113 = vector.broadcast %cst_41 : f32 to vector<32x1xf32>
    %114 = arith.addf %112, %113 : vector<32x1xf32>
    %115 = math.rsqrt %114 : vector<32x1xf32>
    %116 = vector.broadcast %115 : vector<32x1xf32> to vector<32x128xf32>
    %117 = arith.mulf %106, %116 : vector<32x128xf32>
    %118 = vector.broadcast %107 : vector<1x128xf32> to vector<32x128xf32>
    %119 = arith.mulf %118, %117 : vector<32x128xf32>
    %120 = arith.truncf %119 : vector<32x128xf32> to vector<32x128xbf16>
    %c0_42 = arith.constant 0 : index
    %c0_43 = arith.constant 0 : index
    %121 = vector.load %arg9[%c0_42, %c0_43] : memref<128x512xbf16, #tpu.memory_space<vmem>>, vector<128x512xbf16>
    %cst_44 = arith.constant dense<0.000000e+00> : vector<32x512xf32>
    %122 = tpu.matmul %120, %121, %cst_44 {dimension_numbers = #tpu.dot_dimension_numbers<[1], [0], [0], [1], [0, 0, 1, 1], [], []>} : vector<32x128xbf16>, vector<128x512xbf16>, vector<32x512xf32> -> vector<32x512xf32>
    %123 = vector.extract_strided_slice %122 {offsets = [0, 0], sizes = [32, 256], strides = [1, 1]} : vector<32x512xf32> to vector<32x256xf32>
    %124 = vector.extract_strided_slice %122 {offsets = [0, 256], sizes = [32, 256], strides = [1, 1]} : vector<32x512xf32> to vector<32x256xf32>
    %125 = arith.negf %123 : vector<32x256xf32>
    %126 = math.exp %125 : vector<32x256xf32>
    %cst_45 = arith.constant 1.000000e+00 : f32
    %127 = vector.broadcast %cst_45 : f32 to vector<32x256xf32>
    %128 = arith.addf %127, %126 : vector<32x256xf32>
    %129 = arith.divf %127, %128 : vector<32x256xf32>
    %130 = arith.mulf %123, %129 : vector<32x256xf32>
    %131 = arith.mulf %130, %124 : vector<32x256xf32>
    %132 = arith.truncf %131 : vector<32x256xf32> to vector<32x256xbf16>
    %c0_46 = arith.constant 0 : index
    %c0_47 = arith.constant 0 : index
    %133 = vector.load %arg10[%c0_46, %c0_47] : memref<256x128xbf16, #tpu.memory_space<vmem>>, vector<256x128xbf16>
    %cst_48 = arith.constant dense<0.000000e+00> : vector<32x128xf32>
    %134 = tpu.matmul %132, %133, %cst_48 {dimension_numbers = #tpu.dot_dimension_numbers<[1], [0], [0], [1], [0, 0, 1, 1], [], []>} : vector<32x256xbf16>, vector<256x128xbf16>, vector<32x128xf32> -> vector<32x128xf32>
    %135 = arith.addf %106, %134 : vector<32x128xf32>
    %c0_49 = arith.constant 0 : index
    %c0_50 = arith.constant 0 : index
    %136 = vector.load %arg11[%c0_49, %c0_50] : memref<32x128xf32, #tpu.memory_space<vmem>>, vector<32x128xf32>
    tpu.vector_store %arg11[%c0_49, %c0_50], %135 {strides = array<i32>} : memref<32x128xf32, #tpu.memory_space<vmem>>, vector<32x128xf32>,
    return
  }
}

</mosaic_0001>

<bundles_post_ra>
// kernel: tpu_custom_call.1
= control target key start
LH: loop header
LB: loop body
LE: loop exit
PB: predicated region body
PF: predicated region fallthrough
CT: control target
= control target key end

     0   :  { %16 = vsyncpa [#allocation3], 0  ;;  %s4085_s0 = inlined_call_operand.hbm [shape: f32[32,128], index: 0, kind: input, shape index: {}]   ;;  %s4086_s1 = inlined_call_operand.hbm [shape: f32[32,128], index: 1, kind: input, shape index: {}]   ;;  %s4087_s2 = inlined_call_operand.hbm [shape: f32[32,128], index: 2, kind: input, shape index: {}]   ;;  %s4088_s3 = inlined_call_operand.hbm [shape: f32[32,128], index: 3, kind: input, shape index: {}]   ;;  %s4089_s4 = inlined_call_operand.hbm [shape: f32[32,32], index: 4, kind: input, shape index: {}]   ;;  %s4090_s5 = inlined_call_operand.vmem [shape: f32[1,128], index: 5, kind: input, shape index: {}]   ;;  %s4091_s6 = inlined_call_operand.hbm [shape: bf16[128,384], index: 6, kind: input, shape index: {}]   ;;  %s4092_s7 = inlined_call_operand.hbm [shape: bf16[128,128], index: 7, kind: input, shape index: {}]   ;;  %s4093_s8 = inlined_call_operand.vmem [shape: f32[1,128], index: 8, kind: input, shape index: {}]   ;;  %s4094_s9 = inlined_call_operand.hbm [shape: bf16[128,512], index: 9, kind: input, shape index: {}]   ;;  %s4095_s10 = inlined_call_operand.hbm [shape: bf16[256,128], index: 10, kind: input, shape index: {}]   ;;  %s4096_s11 = inlined_call_operand.hbm [shape: f32[32,128], index: 11, kind: output, shape index: {}]  }
   0x1   :  { %17 = vsyncpa [#allocation6], 0 }
   0x2   :  { %18 = vsyncpa [#allocation9], 0 }
   0x3   :  { %19 = vsyncpa [#allocation12], 0 }
   0x4   :  { %20 = vsyncpa [#allocation15], 0 }
   0x5   :  { %21 = vsyncpa [#allocation4], 0  ;;  %s3463_s17 = smov [#allocation5]   ;;  %s3464_s19 = smov [#allocation8]  }
   0x6   :  { %s39_s18 = sshll.u32 %s3463_s17, 4  ;;  %s63_s20 = sshll.u32 %s3464_s19, 4  ;;  %s40_s18 = int_to_ptr.vmem [resolvable:$true] %s39_s18  ;;  %s3545_s20 = int_to_ptr.vmem [resolvable:$true] %s63_s20 }
   0x7   :  { %s3231_s23 = scalar_lea.hbm %s4086_s1, 512 }
   0x8   :  { %p3232_p0 = scmp.ne.s32.totalorder %s4086_s1, %s3231_s23  ;;  %p3235_p1 = scmp.lt.u32.totalorder %s3231_s23, %s4086_s1 }
   0xa   :  { %p3237_p2 = pnand %p3235_p1, %p3232_p0 }
   0xc   :  { %3240 = shalt.err (!%p3237_p2)
}
   0xd   :  { %s3241_s28 = scalar_lea.vmem %s40_s18, 512  ;;  %p3246_p4 = scmp.lt.s32.totalorder %s40_s18, %s40_s18 }
   0xe   :  { %p3242_p3 = scmp.ne.s32.totalorder %s40_s18, %s3241_s28  ;;  %p3247_p5 = scmp.lt.s32.totalorder %s3241_s28, %s3241_s28 }
  0x10   :  { %p3248_p6 = por %p3247_p5, %p3246_p4 }
  0x12   :  { %p3249_p7 = pnand %p3248_p6, %p3242_p3 }
  0x14   :  { %3252 = shalt.err (!%p3249_p7)
}
  0x15   :  { %s3465_s29 = smov 128   ;;  %s3466_s30 = smov 8  }
  0x16   :  { %45 = dma.hbm_to_vmem [thread:$0]  %s4086_s1, 512, %s40_s18, [#allocation6], %s3465_s29, %s3465_s29, %s3466_s30  }
  0x17   :  { %s3253_s16 = scalar_lea.hbm %s4088_s3, 512 }
  0x18   :  { %p3254_p8 = scmp.ne.s32.totalorder %s4088_s3, %s3253_s16  ;;  %p3257_p9 = scmp.lt.u32.totalorder %s3253_s16, %s4088_s3 }
  0x1a   :  { %p3259_p10 = pnand %p3257_p9, %p3254_p8 }
  0x1c   :  { %3262 = shalt.err (!%p3259_p10)
}
  0x1d   :  { %s3263_s23 = scalar_lea.vmem %s3545_s20, 512  ;;  %p3268_p12 = scmp.lt.s32.totalorder %s3545_s20, %s3545_s20 }
  0x1e   :  { %p3264_p11 = scmp.ne.s32.totalorder %s3545_s20, %s3263_s23  ;;  %p3269_p13 = scmp.lt.s32.totalorder %s3263_s23, %s3263_s23 }
  0x20   :  { %p3270_p0 = por %p3269_p13, %p3268_p12 }
  0x22   :  { %p3271_p1 = pnand %p3270_p0, %p3264_p11 }
  0x24   :  { %3274 = shalt.err (!%p3271_p1)
}
  0x25   :  { %69 = dma.hbm_to_vmem [thread:$0]  %s4088_s3, 512, %s3545_s20, [#allocation9], %s3465_s29, %s3465_s29, %s3466_s30  }
  0x26   :  { %s3467_s24 = smov [#allocation11]   ;;  %s3275_s28 = scalar_lea.hbm %s4091_s6, 3072 }
  0x27   :  { %s89_s25 = sshll.u32 %s3467_s24, 4  ;;  %p3276_p2 = scmp.ne.s32.totalorder %s4091_s6, %s3275_s28  ;;  %s90_s25 = int_to_ptr.vmem [resolvable:$true] %s89_s25 }
  0x28   :  { %p3279_p3 = scmp.lt.u32.totalorder %s3275_s28, %s4091_s6 }
  0x2a   :  { %p3281_p4 = pnand %p3279_p3, %p3276_p2 }
  0x2c   :  { %3284 = shalt.err (!%p3281_p4)
}
  0x2d   :  { %s3285_s16 = scalar_lea.vmem %s90_s25, 3072  ;;  %p3290_p6 = scmp.lt.s32.totalorder %s90_s25, %s90_s25 }
  0x2e   :  { %p3286_p5 = scmp.ne.s32.totalorder %s90_s25, %s3285_s16  ;;  %p3291_p7 = scmp.lt.s32.totalorder %s3285_s16, %s3285_s16 }
  0x30   :  { %p3292_p8 = por %p3291_p7, %p3290_p6 }
  0x32   :  { %p3293_p9 = pnand %p3292_p8, %p3286_p5 }
  0x34   :  { %3296 = shalt.err (!%p3293_p9)
}
  0x35   :  { %s3468_s3 = smov 192   ;;  %s3469_s20 = smov 12  }
  0x36   :  { %95 = dma.hbm_to_vmem [thread:$0]  %s4091_s6, 3072, %s90_s25, [#allocation12], %s3468_s3, %s3468_s3, %s3469_s20  }
  0x37   :  { %s3470_s21 = smov [#allocation14]   ;;  %s3297_s18 = scalar_lea.hbm %s4094_s9, 4096 }
  0x38   :  { %s115_s22 = sshll.u32 %s3470_s21, 4  ;;  %p3298_p10 = scmp.ne.s32.totalorder %s4094_s9, %s3297_s18  ;;  %s116_s22 = int_to_ptr.vmem [resolvable:$true] %s115_s22 }
  0x39   :  { %p3301_p11 = scmp.lt.u32.totalorder %s3297_s18, %s4094_s9 }
  0x3b   :  { %p3303_p12 = pnand %p3301_p11, %p3298_p10 }
  0x3d   :  { %3306 = shalt.err (!%p3303_p12)
}
  0x3e   :  { %s3307_s12 = scalar_lea.vmem %s116_s22, 4096  ;;  %p3312_p0 = scmp.lt.s32.totalorder %s116_s22, %s116_s22 }
  0x3f   :  { %p3308_p13 = scmp.ne.s32.totalorder %s116_s22, %s3307_s12  ;;  %p3313_p1 = scmp.lt.s32.totalorder %s3307_s12, %s3307_s12 }
  0x41   :  { %p3314_p2 = por %p3313_p1, %p3312_p0 }
  0x43   :  { %p3315_p3 = pnand %p3314_p2, %p3308_p13 }
  0x45   :  { %3318 = shalt.err (!%p3315_p3)
}
  0x46   :  { %s3471_s6 = smov 256   ;;  %s3472_s25 = smov 16  }
  0x47   :  { %121 = dma.hbm_to_vmem [thread:$0]  %s4094_s9, 4096, %s116_s22, [#allocation15], %s3471_s6, %s3471_s6, %s3472_s25  }
  0x48   :  { %s3473_s15 = smov [#allocation2]   ;;  %s3474_s3 = smov [#allocation7]  }
  0x49   :  { %s27_s16 = sshll.u32 %s3473_s15, 4  ;;  %s51_s20 = sshll.u32 %s3474_s3, 4  ;;  %s28_s16 = int_to_ptr.vmem [resolvable:$true] %s27_s16  ;;  %s3607_s20 = int_to_ptr.vmem [resolvable:$true] %s51_s20 }
  0x4a   :  { %s3319_s21 = scalar_lea.hbm %s4085_s0, 512 }
  0x4b   :  { %p3320_p4 = scmp.ne.s32.totalorder %s4085_s0, %s3319_s21  ;;  %p3323_p5 = scmp.lt.u32.totalorder %s3319_s21, %s4085_s0 }
  0x4d   :  { %p3325_p6 = pnand %p3323_p5, %p3320_p4 }
  0x4f   :  { %3328 = shalt.err (!%p3325_p6)
}
  0x50   :  { %s3329_s9 = scalar_lea.vmem %s28_s16, 512  ;;  %p3334_p8 = scmp.lt.s32.totalorder %s28_s16, %s28_s16 }
  0x51   :  { %p3330_p7 = scmp.ne.s32.totalorder %s28_s16, %s3329_s9  ;;  %p3335_p9 = scmp.lt.s32.totalorder %s3329_s9, %s3329_s9 }
  0x53   :  { %p3336_p10 = por %p3335_p9, %p3334_p8 }
  0x55   :  { %p3337_p11 = pnand %p3336_p10, %p3330_p7 }
  0x57   :  { %3340 = shalt.err (!%p3337_p11)
}
  0x58   :  { %33 = dma.hbm_to_vmem [thread:$0]  %s4085_s0, 512, %s28_s16, [#allocation3], %s3465_s29, %s3465_s29, %s3466_s30  }
  0x59   :  { %s3341_s12 = scalar_lea.hbm %s4087_s2, 512 }
  0x5a   :  { %p3342_p12 = scmp.ne.s32.totalorder %s4087_s2, %s3341_s12  ;;  %p3345_p13 = scmp.lt.u32.totalorder %s3341_s12, %s4087_s2 }
  0x5c   :  { %p3347_p0 = pnand %p3345_p13, %p3342_p12 }
  0x5e   :  { %3350 = shalt.err (!%p3347_p0)
}
  0x5f   :  { %s3351_s3 = scalar_lea.vmem %s3607_s20, 512  ;;  %p3356_p2 = scmp.lt.s32.totalorder %s3607_s20, %s3607_s20 }
  0x60   :  { %p3352_p1 = scmp.ne.s32.totalorder %s3607_s20, %s3351_s3  ;;  %p3357_p3 = scmp.lt.s32.totalorder %s3351_s3, %s3351_s3 }
  0x62   :  { %p3358_p4 = por %p3357_p3, %p3356_p2 }
  0x64   :  { %p3359_p5 = pnand %p3358_p4, %p3352_p1 }
  0x66   :  { %3362 = shalt.err (!%p3359_p5)
}
  0x67   :  { %57 = dma.hbm_to_vmem [thread:$0]  %s4087_s2, 512, %s3607_s20, [#allocation6], %s3465_s29, %s3465_s29, %s3466_s30  }
  0x68   :  { %s3475_s17 = smov [#allocation10]   ;;  %s3476_s21 = smov [#allocation13]  }
  0x69   :  { %s75_s19 = sshll.u32 %s3475_s17, 4  ;;  %s101_s23 = sshll.u32 %s3476_s21, 4  ;;  %s76_s19 = int_to_ptr.vmem [resolvable:$true] %s75_s19  ;;  %s3644_s23 = int_to_ptr.vmem [resolvable:$true] %s101_s23 }
  0x6a   :  { %s3363_s24 = scalar_lea.hbm %s4089_s4, 512 }
  0x6b   :  { %p3364_p6 = scmp.ne.s32.totalorder %s4089_s4, %s3363_s24  ;;  %p3367_p7 = scmp.lt.u32.totalorder %s3363_s24, %s4089_s4 }
  0x6d   :  { %p3369_p8 = pnand %p3367_p7, %p3364_p6 }
  0x6f   :  { %3372 = shalt.err (!%p3369_p8)
}
  0x70   :  { %s3373_s2 = scalar_lea.vmem %s76_s19, 512  ;;  %p3378_p10 = scmp.lt.s32.totalorder %s76_s19, %s76_s19 }
  0x71   :  { %p3374_p9 = scmp.ne.s32.totalorder %s76_s19, %s3373_s2  ;;  %p3379_p11 = scmp.lt.s32.totalorder %s3373_s2, %s3373_s2 }
  0x73   :  { %p3380_p12 = por %p3379_p11, %p3378_p10 }
  0x75   :  { %p3381_p13 = pnand %p3380_p12, %p3374_p9 }
  0x77   :  { %3384 = shalt.err (!%p3381_p13)
}
  0x78   :  { %81 = dma.hbm_to_vmem [thread:$0]  %s4089_s4, 512, %s76_s19, [#allocation9], %s3465_s29, %s3465_s29, %s3466_s30  }
  0x79   :  { %s3385_s13 = scalar_lea.hbm %s4092_s7, 1024 }
  0x7a   :  { %p3386_p0 = scmp.ne.s32.totalorder %s4092_s7, %s3385_s13  ;;  %p3389_p1 = scmp.lt.u32.totalorder %s3385_s13, %s4092_s7 }
  0x7c   :  { %p3391_p2 = pnand %p3389_p1, %p3386_p0 }
  0x7e   :  { %3394 = shalt.err (!%p3391_p2)
}
  0x7f   :  { %s3395_s16 = scalar_lea.vmem %s3644_s23, 1024  ;;  %p3400_p4 = scmp.lt.s32.totalorder %s3644_s23, %s3644_s23 }
  0x80   :  { %p3396_p3 = scmp.ne.s32.totalorder %s3644_s23, %s3395_s16  ;;  %p3401_p5 = scmp.lt.s32.totalorder %s3395_s16, %s3395_s16 }
  0x82   :  { %p3402_p6 = por %p3401_p5, %p3400_p4 }
  0x84   :  { %p3403_p7 = pnand %p3402_p6, %p3396_p3 }
  0x86   :  { %3406 = shalt.err (!%p3403_p7)
}
  0x87   :  { %s3477_s4 = smov 64   ;;  %s3478_s17 = smov 4  }
  0x88   :  { %107 = dma.hbm_to_vmem [thread:$0]  %s4092_s7, 1024, %s3644_s23, [#allocation12], %s3477_s4, %s3477_s4, %s3478_s17  }
  0x89   :  { %s3479_s1 = smov [#allocation16]   ;;  %s3407_s22 = scalar_lea.hbm %s4095_s10, 2048 }
  0x8a   :  { %s127_s18 = sshll.u32 %s3479_s1, 4  ;;  %p3408_p8 = scmp.ne.s32.totalorder %s4095_s10, %s3407_s22  ;;  %s128_s18 = int_to_ptr.vmem [resolvable:$true] %s127_s18 }
  0x8b   :  { %p3411_p9 = scmp.lt.u32.totalorder %s3407_s22, %s4095_s10 }
  0x8d   :  { %p3413_p10 = pnand %p3411_p9, %p3408_p8 }
  0x8f   :  { %3416 = shalt.err (!%p3413_p10)
}
  0x90   :  { %s3417_s28 = scalar_lea.vmem %s128_s18, 2048  ;;  %p3422_p12 = scmp.lt.s32.totalorder %s128_s18, %s128_s18 }
  0x91   :  { %p3418_p11 = scmp.ne.s32.totalorder %s128_s18, %s3417_s28  ;;  %p3423_p13 = scmp.lt.s32.totalorder %s3417_s28, %s3417_s28 }
  0x93   :  { %p3424_p0 = por %p3423_p13, %p3422_p12 }
  0x95   :  { %p3425_p1 = pnand %p3424_p0, %p3418_p11 }
  0x97   :  { %3428 = shalt.err (!%p3425_p1)
}
  0x98   :  { %133 = dma.hbm_to_vmem [thread:$0]  %s4095_s10, 2048, %s128_s18, [#allocation15], %s3477_s4, %s3477_s4, %s3478_s17  }
  0x99   :  { %3451 = dma.done.wait [#allocation3], 512  }
  0x9a   :  { %3452 = vsyncadd [#allocation3], 4294966784 }
  0x9b   :  { %3453 = dma.done.wait [#allocation6], 1024  }
  0x9c   :  { %3454 = vsyncadd [#allocation6], 4294966272 }
  0x9d   :  { %3455 = dma.done.wait [#allocation9], 1024  }
  0x9e   :  { %3456 = vsyncadd [#allocation9], 4294966272 }
  0x9f   :  { %3457 = dma.done.wait [#allocation12], 4096  }
  0xa0   :  { %3458 = vsyncadd [#allocation12], 4294963200 }
  0xa1   :  { %3459 = dma.done.wait [#allocation15], 6144  }
  0xa2   :  { %3460 = vsyncadd [#allocation15], 4294961152  ;;  %v3694_v0 = vld [vmem:[#allocation2] sm:$0xff]  ;;  %v3696_v1 = vld [vmem:[#allocation2 + $0x10] sm:$0xff]  ;;  %v3480_v30 = vmov 0   ;;  %vm558_vm0 = vcmask 261120  }
  0xa3   :  { %v3698_v2 = vld [vmem:[#allocation2 + $0x8] sm:$0xff]  ;;  %v167_v3 = vmul.f32 %v3694_v0, %v3694_v0  ;;  %v169_v4 = vmul.f32 %v3696_v1, %v3696_v1  ;;  %v3704_v5 = vld [vmem:[#allocation2 + $0x18] sm:$0xff]  ;;  %v3011_v6 = vld [vmem:[#allocation11 + $0x4] ss:$12 sps:$4 sm:$0xff]   ;;  %400 = vmatprep.mubr.bf16.mxu0 %v3480_v30  ;;  %s3483_s6 = smov 32   ;;  %vm1675_vm2 = vcmask 523264  }
  0xa4   :  { %v3013_v7 = vld [vmem:[#allocation11] ss:$12 sps:$4 sm:$0xff]   ;;  %v168_v8 = vmul.f32 %v3698_v2, %v3698_v2  ;;  %v170_v9 = vmul.f32 %v3704_v5, %v3704_v5  ;;  %v3014_v10 = vld [vmem:[#allocation11 + $0x8] ss:$12 sps:$4 sm:$0xff]   ;;  %368 = vmatprep.subr.bf16.mxu0 %v3011_v6  ;;  %v3017_v12 = vld [vmem:[#allocation11 + $0x18] ss:$12 sps:$4 sm:$0xff]  }
  0xa5   :  { %171 = vadd.xlane.f32.xlu0 %v167_v3  ;;  %175 = vadd.xlane.f32.xlu1 %v169_v4  ;;  %v3015_v11 = vld [vmem:[#allocation11 + $0x1c] ss:$12 sps:$4 sm:$0xff]   ;;  %v3018_v13 = vld [vmem:[#allocation11 + $0x20] ss:$12 sps:$4 sm:$0xff]   ;;  %v3022_v16 = vld [vmem:[#allocation11 + $0x38] ss:$12 sps:$4 sm:$0xff]  }
  0xa6   :  { %369 = vmatpush1.bf16.msra.mxu0 %v3013_v7  ;;  %2667 = vmatprep.subr.bf16.mxu1 %v3014_v10  ;;  %v3019_v14 = vld [vmem:[#allocation11 + $0x34] ss:$12 sps:$4 sm:$0xff]   ;;  %v3021_v15 = vld [vmem:[#allocation11 + $0x30] ss:$12 sps:$4 sm:$0xff]   ;;  %v3023_v17 = vld [vmem:[#allocation11 + $0x4c] ss:$12 sps:$4 sm:$0xff]  }
  0xa7   :  { %2668 = vmatpush3.bf16.msra.mxu1 %v3014_v10  ;;  %370 = vmatprep.subr.bf16.mxu0 %v3015_v11  ;;  %v3025_v18 = vld [vmem:[#allocation11 + $0x48] ss:$12 sps:$4 sm:$0xff]   ;;  %v3026_v19 = vld [vmem:[#allocation11 + $0x50] ss:$12 sps:$4 sm:$0xff]   ;;  %v3029_v21 = vld [vmem:[#allocation11 + $0x60] ss:$12 sps:$4 sm:$0xff]  }
  0xa8   :  { %2669 = vmatprep.subr.bf16.mxu1 %v3018_v13  ;;  %v3027_v20 = vld [vmem:[#allocation11 + $0x64] ss:$12 sps:$4 sm:$0xff]   ;;  %v3030_v22 = vld [vmem:[#allocation11 + $0x68] ss:$12 sps:$4 sm:$0xff]   ;;  %v3034_v24 = vld [vmem:[#allocation11 + $0x80] ss:$12 sps:$4 sm:$0xff]  }
  0xa9   :  { %173 = vadd.xlane.f32.xlu0 %v168_v8  ;;  %177 = vadd.xlane.f32.xlu1 %v170_v9  ;;  %v3031_v23 = vld [vmem:[#allocation11 + $0x7c] ss:$12 sps:$4 sm:$0xff]   ;;  %v3033_v25 = vld [vmem:[#allocation11 + $0x78] ss:$12 sps:$4 sm:$0xff]   ;;  %v3035_v26 = vld [vmem:[#allocation11 + $0x94] ss:$12 sps:$4 sm:$0xff]  }
  0xaa   :  { %371 = vmatpush1.bf16.msra.mxu0 %v3017_v12  ;;  %v3037_v27 = vld [vmem:[#allocation11 + $0x90] ss:$12 sps:$4 sm:$0xff]   ;;  %v3038_v28 = vld [vmem:[#allocation11 + $0x98] ss:$12 sps:$4 sm:$0xff]   ;;  %v3041_v32 = vld [vmem:[#allocation11 + $0xa8] ss:$12 sps:$4 sm:$0xff]  }
  0xab   :  { %2670 = vmatpush3.bf16.msra.mxu1 %v3018_v13  ;;  %372 = vmatprep.subr.bf16.mxu0 %v3019_v14  ;;  %v3039_v29 = vld [vmem:[#allocation11 + $0xac] ss:$12 sps:$4 sm:$0xff]   ;;  %v3042_v31 = vld [vmem:[#allocation11 + $0xb0] ss:$12 sps:$4 sm:$0xff]   ;;  %v2417_v50 = vld [vmem:[%s4090_s5] ss:$0 sm:$0xff] }
  0xac   :  { %2671 = vmatprep.subr.bf16.mxu1 %v3022_v16  ;;  %s3481_s5 = smov 112   ;;  %v474_v13 = vld [vmem:[#allocation7] sm:$0xff]  ;;  %vm3757_vm1 = vmpackc.low %vm558_vm0, %vm558_vm0  ;;  %vm1680_vm3 = vcmask 785408  }
  0xae   :  { %373 = vmatpush1.bf16.msra.mxu0 %v3021_v15  ;;  %v470_v15 = vld [vmem:[#allocation5] sm:$0xff] }
  0xaf   :  { %2672 = vmatpush3.bf16.msra.mxu1 %v3022_v16  ;;  %374 = vmatprep.subr.bf16.mxu0 %v3023_v17  ;;  %v475_v16 = vld [vmem:[#allocation7 + $0x8] sm:$0xff] }
  0xb0   :  { %2673 = vmatprep.subr.bf16.mxu1 %v3026_v19 }
  0xb2   :  { %375 = vmatpush1.bf16.msra.mxu0 %v3025_v18  ;;  %v471_v18 = vld [vmem:[#allocation5 + $0x8] sm:$0xff] }
  0xb3   :  { %2674 = vmatpush3.bf16.msra.mxu1 %v3026_v19  ;;  %376 = vmatprep.subr.bf16.mxu0 %v3027_v20 }
  0xb4   :  { %2675 = vmatprep.subr.bf16.mxu1 %v3030_v22 }
  0xb6   :  { %377 = vmatpush1.bf16.msra.mxu0 %v3029_v21 }
  0xb7   :  { %2676 = vmatpush3.bf16.msra.mxu1 %v3030_v22  ;;  %378 = vmatprep.subr.bf16.mxu0 %v3031_v23  ;;  %v478_v22 = vld [vmem:[#allocation8] sm:$0xff]  ;;  %v479_v23 = vld [vmem:[#allocation8 + $0x8] sm:$0xff] }
  0xb8   :  { %2677 = vmatprep.subr.bf16.mxu1 %v3034_v24 }
  0xba   :  { %379 = vmatpush1.bf16.msra.mxu0 %v3033_v25 }
  0xbb   :  { %2678 = vmatpush3.bf16.msra.mxu1 %v3034_v24  ;;  %380 = vmatprep.subr.bf16.mxu0 %v3035_v26 }
  0xbc   :  { %2679 = vmatprep.subr.bf16.mxu1 %v3038_v28 }
  0xbe   :  { %381 = vmatpush1.bf16.msra.mxu0 %v3037_v27 }
  0xbf   :  { %2680 = vmatpush3.bf16.msra.mxu1 %v3038_v28  ;;  %382 = vmatprep.subr.bf16.mxu0 %v3039_v29 }
  0xc0   :  { %2681 = vmatprep.subr.bf16.mxu1 %v3042_v31 }
  0xc2   :  { %383 = vmatpush1.bf16.msra.mxu0 %v3041_v32  ;;  %v476_v32 = vld [vmem:[#allocation7 + $0x10] sm:$0xff] }
  0xc3   :  { %2682 = vmatpush3.bf16.msra.mxu1 %v3042_v31 }
 0x132   :  { %v172_v33 = vpop.xlane.xlu0 %171  ;;  %v176_v34 = vpop.xlane.xlu1 %175 }
 0x133   :  { %v180_v35 = vmul.f32 0.0078125, %v172_v33  ;;  %v182_v36 = vmul.f32 0.0078125, %v176_v34  ;;  %v477_v33 = vld [vmem:[#allocation7 + $0x18] sm:$0xff]  ;;  %v472_v34 = vld [vmem:[#allocation5 + $0x10] sm:$0xff] }
 0x135   :  { %v184_v37 = vadd.f32 1e-06, %v180_v35  ;;  %v186_v38 = vadd.f32 1e-06, %v182_v36 }
 0x136   :  { %v174_v39 = vpop.xlane.xlu0 %173  ;;  %v178_v40 = vpop.xlane.xlu1 %177 }
 0x137   :  { %3115 = vrsqrt.f32 %v184_v37  ;;  %v181_v41 = vmul.f32 0.0078125, %v174_v39  ;;  %v183_v42 = vmul.f32 0.0078125, %v178_v40  ;;  %v473_v37 = vld [vmem:[#allocation5 + $0x18] sm:$0xff] }
 0x138   :  { %3117 = vrsqrt.f32 %v186_v38  ;;  %v480_v38 = vld [vmem:[#allocation8 + $0x10] sm:$0xff] }
 0x139   :  { %v185_v43 = vadd.f32 1e-06, %v181_v41  ;;  %v187_v44 = vadd.f32 1e-06, %v183_v42 }
 0x13b   :  { %3119 = vrsqrt.f32 %v185_v43 }
 0x13c   :  { %3121 = vrsqrt.f32 %v187_v44 }
 0x141   :  { %v3116_v45 = vpop.eup %3115 }
 0x142   :  { %v3118_v46 = vpop.eup %3117  ;;  %v192_v48 = vmul.f32 %v3116_v45, %v3694_v0 }
 0x143   :  { %v194_v47 = vmul.f32 %v3118_v46, %v3696_v1  ;;  %v481_v46 = vld [vmem:[#allocation8 + $0x18] sm:$0xff] }
 0x144   :  { %v202_v55 = vmul.f32 %v2417_v50, %v192_v48 }
 0x145   :  { %v3120_v49 = vpop.eup %3119  ;;  %v204_v54 = vmul.f32 %v2417_v50, %v194_v47 }
 0x146   :  { %v3122_v51 = vpop.eup %3121  ;;  %v193_v52 = vmul.f32 %v3120_v49, %v3698_v2 }
 0x147   :  { %v195_v53 = vmul.f32 %v3122_v51, %v3704_v5 }
 0x148   :  { %v203_v56 = vmul.f32 %v2417_v50, %v193_v52 }
 0x149   :  { %v205_v57 = vmul.f32 %v2417_v50, %v195_v53 }
 0x14a   :  { %v206_v58 = vpack.c.bf16 %v203_v56, %v202_v55 }
 0x14b   :  { %v207_v59 = vpack.c.bf16 %v205_v57, %v204_v54 }
 0x14c   :  { %401 = vmatmul.mubr.bf16.vlgmr.msra.gmra.mrb[0].mxu0 %v206_v58  ;;  %2683 = vmatprep.mubr.bf16.mxu1 %v206_v58 }
 0x14d   :  { %2684 = vmatmul.mubr.bf16.vlgmr.msra.gmra.mrb[0].mxu1 %v207_v59  ;;  %410 = vmatprep.mubr.bf16.mxu0 %v3480_v30 }
 0x154   :  { %411 = vmatmul.mubr.bf16.gmra.mrb[4].mxu0 %v207_v59 }
 0x21f   :  { %v3719_v60 = vpop.f32.mrb[0].mxu0 }
 0x220   :  { %v404_v61 = vpop.f32.mrb[1].mxu0  ;;  %v2685_v62 = vpop.f32.mrb[0].mxu1  ;;  %v482_v56 = vmul.f32 %v470_v15, %v3719_v60 }
 0x221   :  { %v455_v63 = vpop.f32.mrb[1].mxu1  ;;  %538 = vrot.lane.b32.xlu1 %v404_v61, %s3472_s25  ;;  %522 = vrot.lane.b32.xlu0 %v404_v61, %s3481_s5  ;;  %v3723_v0 = vpop.f32.mrb[2].mxu0  ;;  %v518_v20 = vmul.f32 %v470_v15, %v404_v61 }
 0x222   :  { %v408_v1 = vpop.f32.mrb[3].mxu0  ;;  %v2686_v2 = vpop.f32.mrb[2].mxu1 }
 0x223   :  { %v458_v3 = vpop.f32.mrb[3].mxu1  ;;  %v2835_v4 = vpack.c.bf16 %v2686_v2, %v2685_v62  ;;  %v3725_v5 = vpack.i.bf16 %v2686_v2, %v2685_v62  ;;  %v519_v24 = vmul.f32 %v471_v18, %v408_v1 }
 0x224   :  { %v2831_v6 = vpack.c.bf16 %v458_v3, %v455_v63  ;;  %v3727_v7 = vpack.i.bf16 %v458_v3, %v455_v63 }
 0x225   :  { %524 = vrot.lane.b32.xlu1 %v408_v1, %s3481_s5 }
 0x226   :  { %2832 = vmatprep.subr.bf16.mxu1 %v2831_v6 }
 0x227   :  { %v3730_v8 = vpop.f32.mrb[4].mxu0  ;;  %2834 = vmatpush3.bf16.msra.mxu1 %v2831_v6 }
 0x228   :  { %v414_v9 = vpop.f32.mrb[5].mxu0  ;;  %2836 = vmatprep.subr.bf16.mxu1 %v2835_v4 }
 0x229   :  { %540 = vrot.lane.b32.xlu1 %v408_v1, %s3472_s25  ;;  %526 = vrot.lane.b32.xlu0 %v414_v9, %s3481_s5  ;;  %v3734_v10 = vpop.f32.mrb[6].mxu0  ;;  %v520_v47 = vmul.f32 %v472_v34, %v414_v9 }
 0x22a   :  { %v418_v11 = vpop.f32.mrb[7].mxu0 }
 0x22b   :  { %2838 = vmatpush3.bf16.msra.mxu1 %v2835_v4  ;;  %v521_v48 = vmul.f32 %v473_v37, %v418_v11 }
 0x22d   :  { %542 = vrot.lane.b32.xlu0 %v414_v9, %s3472_s25  ;;  %528 = vrot.lane.b32.xlu1 %v418_v11, %s3481_s5 }
 0x231   :  { %486 = vrot.lane.b32.xlu0 %v3719_v60, %s3481_s5  ;;  %544 = vrot.lane.b32.xlu1 %v418_v11, %s3472_s25 }
 0x235   :  { %502 = vrot.lane.b32.xlu0 %v3719_v60, %s3472_s25  ;;  %488 = vrot.lane.b32.xlu1 %v3723_v0, %s3481_s5  ;;  %v483_v60 = vmul.f32 %v471_v18, %v3723_v0 }
 0x239   :  { %490 = vrot.lane.b32.xlu0 %v3730_v8, %s3481_s5  ;;  %504 = vrot.lane.b32.xlu1 %v3723_v0, %s3472_s25 }
 0x23d   :  { %506 = vrot.lane.b32.xlu0 %v3730_v8, %s3472_s25  ;;  %492 = vrot.lane.b32.xlu1 %v3734_v10, %s3481_s5 }
 0x241   :  { %508 = vrot.lane.b32.xlu1 %v3734_v10, %s3472_s25  ;;  %s3482_s25 = smov 96  }
 0x293   :  { %v539_v12 = vpop.permute.xlu1 %538  ;;  %v523_v14 = vpop.permute.xlu0 %522 }
 0x294   :  { %v530_v17 = vmul.f32 %v523_v14, %v474_v13  ;;  %v546_v28 = vmul.f32 %v539_v12, %v478_v22 }
 0x296   :  { %v534_v25 = vadd.f32 %v530_v17, %v518_v20 }
 0x297   :  { %v525_v19 = vpop.permute.xlu1 %524 }
 0x298   :  { %v531_v21 = vmul.f32 %v525_v19, %v475_v16  ;;  %v550_v35 = vadd.f32 %v546_v28, %v534_v25  ;;  %v3793_v25 = vld [vmem:[#allocation10 + $0x8] sm:$0xff] }
 0x29a   :  { %v535_v29 = vadd.f32 %v531_v21, %v519_v24 }
 0x29b   :  { %v541_v26 = vpop.permute.xlu1 %540  ;;  %v527_v27 = vpop.permute.xlu0 %526 }
 0x29c   :  { %v547_v31 = vmul.f32 %v541_v26, %v479_v23  ;;  %v532_v42 = vmul.f32 %v527_v27, %v476_v32  ;;  %v3795_v26 = vld [vmem:[#allocation10] sm:$0xff] }
 0x29e   :  { %v551_v36 = vadd.f32 %v547_v31, %v535_v29  ;;  %v536_v52 = vadd.f32 %v532_v42, %v520_v47 }
 0x29f   :  { %v543_v39 = vpop.permute.xlu0 %542  ;;  %v529_v40 = vpop.permute.xlu1 %528 }
 0x2a0   :  { %v533_v43 = vmul.f32 %v529_v40, %v477_v33  ;;  %v2819_v44 = vpack.c.bf16 %v551_v36, %v550_v35  ;;  %v3761_v45 = vpack.i.bf16 %v551_v36, %v550_v35  ;;  %v548_v49 = vmul.f32 %v543_v39, %v480_v38  ;;  %v3803_v35 = vld [vmem:[#allocation10 + $0x10] sm:$0xff] }
 0x2a2   :  { %2821 = vmatprep.subr.msk.bf16.mxu0 %vm3757_vm1, %v2819_v44  ;;  %v537_v53 = vadd.f32 %v533_v43, %v521_v48  ;;  %v552_v57 = vadd.f32 %v548_v49, %v536_v52 }
 0x2a3   :  { %2824 = vmatpush3.bf16.xpose.msk.msra.mxu0 %vm3757_vm1, %v2819_v44  ;;  %v487_v50 = vpop.permute.xlu0 %486  ;;  %v545_v51 = vpop.permute.xlu1 %544 }
 0x2a4   :  { %v494_v54 = vmul.f32 %v487_v50, %v474_v13  ;;  %v549_v55 = vmul.f32 %v545_v51, %v481_v46  ;;  %v484_v13 = vmul.f32 %v472_v34, %v3730_v8 }
 0x2a6   :  { %v553_v58 = vadd.f32 %v549_v55, %v537_v53  ;;  %v498_v62 = vadd.f32 %v494_v54, %v482_v56 }
 0x2a7   :  { %v503_v59 = vpop.permute.xlu0 %502  ;;  %v489_v61 = vpop.permute.xlu1 %488 }
 0x2a8   :  { %v510_v63 = vmul.f32 %v503_v59, %v478_v22  ;;  %v2825_v1 = vpack.c.bf16 %v553_v58, %v552_v57  ;;  %v3768_v2 = vpack.i.bf16 %v553_v58, %v552_v57  ;;  %v495_v4 = vmul.f32 %v489_v61, %v475_v16 }
 0x2a9   :  { %v485_v22 = vmul.f32 %v473_v37, %v3734_v10 }
 0x2aa   :  { %v3770_v3 = vadd.f32 %v510_v63, %v498_v62  ;;  %2827 = vmatprep.subr.msk.bf16.mxu0 %vm3757_vm1, %v2825_v1  ;;  %v499_v14 = vadd.f32 %v495_v4, %v483_v60 }
 0x2ab   :  { %v491_v6 = vpop.permute.xlu0 %490  ;;  %v505_v9 = vpop.permute.xlu1 %504  ;;  %2830 = vmatpush3.bf16.xpose.msk.msra.mxu0 %vm3757_vm1, %v2825_v1 }
 0x2ac   :  { %v496_v11 = vmul.f32 %v491_v6, %v476_v32  ;;  %v511_v12 = vmul.f32 %v505_v9, %v479_v23  ;;  %2695 = vmatprep.mubr.msk.f32.mxu0 %vm558_vm0, %v3770_v3 }
 0x2ae   :  { %v500_v17 = vadd.f32 %v496_v11, %v484_v13  ;;  %v3780_v19 = vadd.f32 %v511_v12, %v499_v14 }
 0x2af   :  { %v507_v15 = vpop.permute.xlu0 %506  ;;  %v493_v16 = vpop.permute.xlu1 %492 }
 0x2b0   :  { %v512_v20 = vmul.f32 %v507_v15, %v480_v38  ;;  %v497_v21 = vmul.f32 %v493_v16, %v477_v33  ;;  %v3801_v33 = vld [vmem:[#allocation10 + $0x18] sm:$0xff] }
 0x2b2   :  { %v3783_v24 = vadd.f32 %v512_v20, %v500_v17  ;;  %2696 = vmatmul.mubr.msk.f32.vlgmr.msra.gmra.mrb[8].mxu0 %vm558_vm0, %v3780_v19  ;;  %v501_v18 = vadd.f32 %v497_v21, %v485_v22 }
 0x2b3   :  { %v509_v0 = vpop.permute.xlu1 %508 }
 0x2b4   :  { %v513_v23 = vmul.f32 %v509_v0, %v481_v46  ;;  %2698 = vmatprep.mubr.msk.f32.mxu0 %vm558_vm0, %v3783_v24 }
 0x2b6   :  { %v3789_v8 = vadd.f32 %v513_v23, %v501_v18 }
 0x2b8   :  { %2699 = vmatmul.mubr.msk.f32.gmra.mrb[10].mxu0 %vm558_vm0, %v3789_v8 }
 0x385   :  { %v2697_v10 = vpop.f32.mrb[8].mxu0 }
 0x386   :  { %v655_v27 = vadd.f32 %v2697_v10, %v3793_v25  ;;  %v649_v28 = vpop.f32.mrb[9].mxu0 }
 0x387   :  { %v650_v29 = vadd.f32 %v649_v28, %v3795_v26 }
 0x388   :  { %v671_v31 = vsel %vm558_vm0, %v655_v27, -inf }
 0x389   :  { %672 = vmax.xlane.f32.xlu1 %v671_v31  ;;  %v668_v32 = vsel %vm558_vm0, %v650_v29, -inf }
 0x38a   :  { %669 = vmax.xlane.f32.xlu0 %v668_v32 }
 0x38b   :  { %v2700_v34 = vpop.f32.mrb[10].mxu0 }
 0x38c   :  { %v665_v36 = vadd.f32 %v2700_v34, %v3801_v33  ;;  %v659_v37 = vpop.f32.mrb[11].mxu0 }
 0x38d   :  { %v660_v38 = vadd.f32 %v659_v37, %v3803_v35 }
 0x38e   :  { %v677_v39 = vsel %vm558_vm0, %v665_v36, -inf }
 0x38f   :  { %678 = vmax.xlane.f32.xlu0 %v677_v39  ;;  %v674_v40 = vsel %vm558_vm0, %v660_v38, -inf }
 0x393   :  { %675 = vmax.xlane.f32.xlu0 %v674_v40 }
 0x39a   :  { %2927 = vrot.lane.b32.xlu1 %v3768_v2, %s3482_s25 }
 0x39e   :  { %809 = vrot.lane.b32.xlu1 %v3770_v3, %s3482_s25 }
 0x3a2   :  { %811 = vrot.lane.b32.xlu1 %v3780_v19, %s3482_s25 }
 0x3a6   :  { %815 = vrot.lane.b32.xlu1 %v3789_v8, %s3482_s25 }
 0x3a9   :  { %2922 = vrot.lane.b32.xlu0 %v3761_v45, %s3482_s25 }
 0x3ad   :  { %813 = vrot.lane.b32.xlu0 %v3783_v24, %s3482_s25 }
 0x416   :  { %v673_v42 = vpop.xlane.xlu1 %672 }
 0x417   :  { %v681_v43 = vsub.f32 %v655_v27, %v673_v42  ;;  %v670_v44 = vpop.xlane.xlu0 %669 }
 0x418   :  { %v680_v46 = vsub.f32 %v650_v29, %v670_v44 }
 0x419   :  { %v686_v47 = vmul.f32 1.442695, %v681_v43 }
 0x41a   :  { %v684_v48 = vmul.f32 1.442695, %v680_v46  ;;  %v2928_v52 = vpop.permute.xlu1 %2927 }
 0x41b   :  { %v2930_v56 = vunpack.i.h.bf16 %v2928_v52  ;;  %v2929_v58 = vunpack.i.l.bf16 %v2928_v52 }
 0x41c   :  { %3123 = vpow2.f32 %v684_v48  ;;  %v679_v49 = vpop.xlane.xlu0 %678 }
 0x41d   :  { %3125 = vpow2.f32 %v686_v47  ;;  %v683_v50 = vsub.f32 %v665_v36, %v679_v49  ;;  %v2845_v4 = vpack.c.bf16 %v2930_v56, %v2929_v58 }
 0x41e   :  { %v810_v60 = vpop.permute.xlu1 %809 }
 0x41f   :  { %v690_v54 = vmul.f32 1.442695, %v683_v50 }
 0x420   :  { %v676_v51 = vpop.xlane.xlu0 %675 }
 0x421   :  { %v682_v53 = vsub.f32 %v660_v38, %v676_v51 }
 0x422   :  { %v812_v11 = vpop.permute.xlu1 %811 }
 0x423   :  { %v688_v55 = vmul.f32 1.442695, %v682_v53 }
 0x424   :  { %v2923_v57 = vpop.permute.xlu0 %2922 }
 0x425   :  { %3127 = vpow2.f32 %v688_v55  ;;  %v2925_v59 = vunpack.i.h.bf16 %v2923_v57  ;;  %v2924_v61 = vunpack.i.l.bf16 %v2923_v57 }
 0x426   :  { %v3821_v62 = vpop.eup %3123  ;;  %3129 = vpow2.f32 %v690_v54  ;;  %v816_v13 = vpop.permute.xlu1 %815 }
 0x427   :  { %v3823_v63 = vpop.eup %3125  ;;  %v2839_v1 = vpack.c.bf16 %v2925_v59, %v2924_v61  ;;  %2709 = vmatprep.mubr.msk.f32.mxu1 %vm558_vm0, %v3821_v62 }
 0x428   :  { %2710 = vmatmul.mubr.msk.f32.vlgmr.msra.gmra.mrb[4].mxu1 %vm558_vm0, %v3823_v63  ;;  %v814_v12 = vpop.permute.xlu0 %813 }
 0x429   :  { %2841 = vmatprep.subr.msk.bf16.mxu1 %vm3757_vm1, %v2839_v1 }
 0x42a   :  { %2844 = vmatpush3.bf16.xpose.msk.msra.mxu1 %vm3757_vm1, %v2839_v1 }
 0x42b   :  { %2847 = vmatprep.subr.msk.bf16.mxu1 %vm3757_vm1, %v2845_v4 }
 0x42f   :  { %v3835_v6 = vpop.eup %3127 }
 0x430   :  { %v3837_v9 = vpop.eup %3129  ;;  %2712 = vmatprep.mubr.msk.f32.mxu1 %vm558_vm0, %v3835_v6 }
 0x431   :  { %2713 = vmatmul.mubr.msk.f32.gmra.mrb[6].mxu1 %vm558_vm0, %v3837_v9 }
 0x432   :  { %2850 = vmatpush3.bf16.xpose.msk.msra.mxu1 %vm3757_vm1, %v2845_v4  ;;  %2723 = vmatprep.mubr.msk.f32.mxu1 %vm558_vm0, %v810_v60 }
 0x439   :  { %2724 = vmatmul.mubr.msk.f32.vlgmr.msra.gmra.mrb[8].mxu1 %vm558_vm0, %v812_v11 }
 0x43a   :  { %2726 = vmatprep.mubr.msk.f32.mxu1 %vm558_vm0, %v814_v12 }
 0x43d   :  { %2727 = vmatmul.mubr.msk.f32.gmra.mrb[10].mxu1 %vm558_vm0, %v816_v13 }
 0x4fb   :  { %v3849_v14 = vpop.f32.mrb[4].mxu1 }
 0x4fc   :  { %v3851_v15 = vpop.f32.mrb[5].mxu1 }
 0x504   :  { %v3853_v16 = vpop.f32.mrb[6].mxu1 }
 0x505   :  { %v3855_v17 = vpop.f32.mrb[7].mxu1 }
 0x50c   :  { %v2725_v20 = vpop.f32.mrb[8].mxu1 }
 0x50d   :  { %v913_v21 = vadd.f32 %v2725_v20, %v3793_v25  ;;  %v907_v22 = vpop.f32.mrb[9].mxu1 }
 0x50e   :  { %v908_v0 = vadd.f32 %v907_v22, %v3795_v26 }
 0x50f   :  { %v929_v18 = vsel %vm558_vm0, %v913_v21, -inf }
 0x510   :  { %930 = vmax.xlane.f32.xlu1 %v929_v18  ;;  %v2728_v23 = vpop.f32.mrb[10].mxu1  ;;  %v926_v10 = vsel %vm558_vm0, %v908_v0, -inf }
 0x511   :  { %v923_v27 = vadd.f32 %v2728_v23, %v3801_v33  ;;  %v917_v28 = vpop.f32.mrb[11].mxu1  ;;  %927 = vmax.xlane.f32.xlu0 %v926_v10 }
 0x512   :  { %v918_v31 = vadd.f32 %v917_v28, %v3803_v35 }
 0x513   :  { %v935_v29 = vsel %vm558_vm0, %v923_v27, -inf }
 0x514   :  { %v932_v32 = vsel %vm558_vm0, %v918_v31, -inf }
 0x515   :  { %936 = vmax.xlane.f32.xlu0 %v935_v29 }
 0x519   :  { %933 = vmax.xlane.f32.xlu0 %v932_v32 }
 0x521   :  { %2937 = vrot.lane.b32.xlu1 %v3725_v5, %s3482_s25 }
 0x525   :  { %2942 = vrot.lane.b32.xlu1 %v3761_v45, %s3477_s4 }
 0x529   :  { %2947 = vrot.lane.b32.xlu1 %v3768_v2, %s3477_s4 }
 0x52d   :  { %1085 = vrot.lane.b32.xlu1 %v3780_v19, %s3477_s4 }
 0x52f   :  { %2932 = vrot.lane.b32.xlu0 %v3727_v7, %s3482_s25 }
 0x531   :  { %1089 = vrot.lane.b32.xlu1 %v3789_v8, %s3477_s4 }
 0x533   :  { %1083 = vrot.lane.b32.xlu0 %v3770_v3, %s3477_s4 }
 0x537   :  { %1087 = vrot.lane.b32.xlu0 %v3783_v24, %s3477_s4 }
 0x59d   :  { %v931_v37 = vpop.xlane.xlu1 %930 }
 0x59e   :  { %v928_v34 = vpop.xlane.xlu0 %927  ;;  %v939_v40 = vsub.f32 %v913_v21, %v931_v37 }
 0x59f   :  { %v938_v36 = vsub.f32 %v908_v0, %v928_v34 }
 0x5a0   :  { %v944_v46 = vmul.f32 1.442695, %v939_v40 }
 0x5a1   :  { %v942_v38 = vmul.f32 1.442695, %v938_v36  ;;  %v2938_v42 = vpop.permute.xlu1 %2937 }
 0x5a2   :  { %v937_v39 = vpop.xlane.xlu0 %936  ;;  %v2940_v50 = vunpack.i.h.bf16 %v2938_v42  ;;  %v2939_v51 = vunpack.i.l.bf16 %v2938_v42 }
 0x5a3   :  { %3131 = vpow2.f32 %v942_v38  ;;  %v941_v47 = vsub.f32 %v923_v27, %v937_v39 }
 0x5a4   :  { %3133 = vpow2.f32 %v944_v46  ;;  %v2855_v58 = vpack.c.bf16 %v2940_v50, %v2939_v51 }
 0x5a5   :  { %v948_v54 = vmul.f32 1.442695, %v941_v47  ;;  %v2943_v55 = vpop.permute.xlu1 %2942 }
 0x5a6   :  { %v934_v43 = vpop.xlane.xlu0 %933  ;;  %v2945_v59 = vunpack.i.h.bf16 %v2943_v55  ;;  %v2944_v61 = vunpack.i.l.bf16 %v2943_v55 }
 0x5a7   :  { %v940_v44 = vsub.f32 %v918_v31, %v934_v43 }
 0x5a8   :  { %v2859_v1 = vpack.c.bf16 %v2945_v59, %v2944_v61 }
 0x5a9   :  { %v946_v48 = vmul.f32 1.442695, %v940_v44  ;;  %v2948_v4 = vpop.permute.xlu1 %2947 }
 0x5aa   :  { %v2933_v49 = vpop.permute.xlu0 %2932  ;;  %v2950_v12 = vunpack.i.h.bf16 %v2948_v4  ;;  %v2949_v13 = vunpack.i.l.bf16 %v2948_v4 }
 0x5ab   :  { %v2935_v52 = vunpack.i.h.bf16 %v2933_v49  ;;  %v2934_v53 = vunpack.i.l.bf16 %v2933_v49  ;;  %3135 = vpow2.f32 %v946_v48 }
 0x5ac   :  { %3137 = vpow2.f32 %v948_v54  ;;  %v2865_v22 = vpack.c.bf16 %v2950_v12, %v2949_v13 }
 0x5ad   :  { %v3881_v56 = vpop.eup %3131  ;;  %v2851_v57 = vpack.c.bf16 %v2935_v52, %v2934_v53  ;;  %v1086_v0 = vpop.permute.xlu1 %1085 }
 0x5ae   :  { %2737 = vmatprep.mubr.msk.f32.mxu0 %vm558_vm0, %v3881_v56  ;;  %v3887_v60 = vpop.eup %3133  ;;  %v1084_v21 = vpop.permute.xlu0 %1083 }
 0x5af   :  { %2852 = vmatprep.subr.bf16.mxu0 %v2851_v57 }
 0x5b0   :  { %2854 = vmatpush3.bf16.msra.mxu0 %v2851_v57 }
 0x5b1   :  { %2856 = vmatprep.subr.bf16.mxu0 %v2855_v58  ;;  %v1090_v23 = vpop.permute.xlu1 %1089 }
 0x5b2   :  { %v1088_v18 = vpop.permute.xlu0 %1087 }
 0x5b4   :  { %2858 = vmatpush3.bf16.msra.mxu0 %v2855_v58 }
 0x5b5   :  { %2861 = vmatprep.subr.msk.bf16.mxu0 %vm3757_vm1, %v2859_v1  ;;  %v3889_v11 = vpop.eup %3135 }
 0x5b6   :  { %v3895_v20 = vpop.eup %3137 }
 0x5b7   :  { %2738 = vmatmul.mubr.msk.f32.vlgmr.msra.gmra.mrb[12].mxu0 %vm558_vm0, %v3887_v60 }
 0x5b8   :  { %2740 = vmatprep.mubr.msk.f32.mxu0 %vm558_vm0, %v3889_v11 }
 0x5bb   :  { %2741 = vmatmul.mubr.msk.f32.gmra.mrb[14].mxu0 %vm558_vm0, %v3895_v20 }
 0x5bc   :  { %2751 = vmatprep.mubr.msk.f32.mxu0 %vm558_vm0, %v1084_v21 }
 0x5bd   :  { %2864 = vmatpush3.bf16.xpose.msk.msra.mxu0 %vm3757_vm1, %v2859_v1 }
 0x5be   :  { %2867 = vmatprep.subr.msk.bf16.mxu0 %vm3757_vm1, %v2865_v22 }
 0x5c5   :  { %2870 = vmatpush3.bf16.xpose.msk.msra.mxu0 %vm3757_vm1, %v2865_v22 }
 0x5cc   :  { %2752 = vmatmul.mubr.msk.f32.vlgmr.msra.gmra.mrb[16].mxu0 %vm558_vm0, %v1086_v0 }
 0x5cd   :  { %2754 = vmatprep.mubr.msk.f32.mxu0 %vm558_vm0, %v1088_v18 }
 0x5d0   :  { %2755 = vmatmul.mubr.msk.f32.gmra.mrb[18].mxu0 %vm558_vm0, %v1090_v23 }
 0x68a   :  { %v3909_v10 = vpop.f32.mrb[12].mxu0 }
 0x68b   :  { %v3911_v27 = vpop.f32.mrb[13].mxu0 }
 0x68e   :  { %v3913_v28 = vpop.f32.mrb[14].mxu0 }
 0x68f   :  { %v3915_v29 = vpop.f32.mrb[15].mxu0 }
 0x69f   :  { %v2753_v31 = vpop.f32.mrb[16].mxu0 }
 0x6a0   :  { %v1187_v32 = vadd.f32 %v2753_v31, %v3793_v25  ;;  %v1181_v34 = vpop.f32.mrb[17].mxu0 }
 0x6a1   :  { %v1182_v36 = vadd.f32 %v1181_v34, %v3795_v26 }
 0x6a2   :  { %v1203_v37 = vsel %vm558_vm0, %v1187_v32, -inf }
 0x6a3   :  { %1204 = vmax.xlane.f32.xlu1 %v1203_v37  ;;  %v2756_v38 = vpop.f32.mrb[18].mxu0  ;;  %v1200_v39 = vsel %vm558_vm0, %v1182_v36, -inf }
 0x6a4   :  { %v1197_v40 = vadd.f32 %v2756_v38, %v3801_v33  ;;  %v1191_v42 = vpop.f32.mrb[19].mxu0  ;;  %1201 = vmax.xlane.f32.xlu0 %v1200_v39 }
 0x6a5   :  { %v1192_v44 = vadd.f32 %v1191_v42, %v3803_v35 }
 0x6a6   :  { %v1209_v43 = vsel %vm558_vm0, %v1197_v40, -inf }
 0x6a7   :  { %v1206_v46 = vsel %vm558_vm0, %v1192_v44, -inf }
 0x6a8   :  { %1210 = vmax.xlane.f32.xlu0 %v1209_v43 }
 0x6ac   :  { %1207 = vmax.xlane.f32.xlu0 %v1206_v46 }
 0x6b4   :  { %2957 = vrot.lane.b32.xlu1 %v3725_v5, %s3477_s4 }
 0x6b8   :  { %2962 = vrot.lane.b32.xlu1 %v3761_v45, %s3483_s6 }
 0x6bc   :  { %2967 = vrot.lane.b32.xlu1 %v3768_v2, %s3483_s6 }
 0x6c0   :  { %1355 = vrot.lane.b32.xlu1 %v3780_v19, %s3483_s6 }
 0x6c2   :  { %2952 = vrot.lane.b32.xlu0 %v3727_v7, %s3477_s4 }
 0x6c4   :  { %1359 = vrot.lane.b32.xlu1 %v3789_v8, %s3483_s6 }
 0x6c6   :  { %1353 = vrot.lane.b32.xlu0 %v3770_v3, %s3483_s6 }
 0x6ca   :  { %1357 = vrot.lane.b32.xlu0 %v3783_v24, %s3483_s6 }
 0x730   :  { %v1205_v48 = vpop.xlane.xlu1 %1204 }
 0x731   :  { %v1202_v47 = vpop.xlane.xlu0 %1201  ;;  %v1213_v50 = vsub.f32 %v1187_v32, %v1205_v48 }
 0x732   :  { %v1212_v45 = vsub.f32 %v1182_v36, %v1202_v47 }
 0x733   :  { %v1218_v53 = vmul.f32 1.442695, %v1213_v50 }
 0x734   :  { %v1216_v49 = vmul.f32 1.442695, %v1212_v45  ;;  %v2958_v19 = vpop.permute.xlu1 %2957 }
 0x735   :  { %v1211_v2 = vpop.xlane.xlu0 %1210  ;;  %v2960_v57 = vunpack.i.h.bf16 %v2958_v19  ;;  %v2959_v58 = vunpack.i.l.bf16 %v2958_v19 }
 0x736   :  { %3139 = vpow2.f32 %v1216_v49  ;;  %v1215_v54 = vsub.f32 %v1197_v40, %v1211_v2 }
 0x737   :  { %3141 = vpow2.f32 %v1218_v53  ;;  %v2875_v12 = vpack.c.bf16 %v2960_v57, %v2959_v58 }
 0x738   :  { %v1222_v24 = vmul.f32 1.442695, %v1215_v54  ;;  %v2963_v61 = vpop.permute.xlu1 %2962  ;;  %v953_v54 = vsel %vm558_vm0, %v3887_v60, 0.0 }
 0x739   :  { %v1208_v51 = vpop.xlane.xlu0 %1207  ;;  %v2965_v13 = vunpack.i.h.bf16 %v2963_v61  ;;  %v2964_v21 = vunpack.i.l.bf16 %v2963_v61 }
 0x73a   :  { %v1214_v52 = vsub.f32 %v1192_v44, %v1208_v51 }
 0x73b   :  { %v2879_v22 = vpack.c.bf16 %v2965_v13, %v2964_v21 }
 0x73c   :  { %v1220_v55 = vmul.f32 1.442695, %v1214_v52  ;;  %v2968_v0 = vpop.permute.xlu1 %2967 }
 0x73d   :  { %v2953_v8 = vpop.permute.xlu0 %2952  ;;  %v2970_v31 = vunpack.i.h.bf16 %v2968_v0  ;;  %v2969_v32 = vunpack.i.l.bf16 %v2968_v0 }
 0x73e   :  { %v2955_v3 = vunpack.i.h.bf16 %v2953_v8  ;;  %v2954_v59 = vunpack.i.l.bf16 %v2953_v8  ;;  %3143 = vpow2.f32 %v1220_v55 }
 0x73f   :  { %3145 = vpow2.f32 %v1222_v24  ;;  %v2885_v37 = vpack.c.bf16 %v2970_v31, %v2969_v32 }
 0x740   :  { %v3941_v1 = vpop.eup %3139  ;;  %v2871_v4 = vpack.c.bf16 %v2955_v3, %v2954_v59  ;;  %v1356_v38 = vpop.permute.xlu1 %1355 }
 0x741   :  { %2765 = vmatprep.mubr.msk.f32.mxu1 %vm558_vm0, %v3941_v1  ;;  %v3142_v18 = vpop.eup %3141  ;;  %v1354_v36 = vpop.permute.xlu0 %1353 }
 0x742   :  { %2872 = vmatprep.subr.bf16.mxu1 %v2871_v4 }
 0x743   :  { %2874 = vmatpush3.bf16.msra.mxu1 %v2871_v4 }
 0x744   :  { %2876 = vmatprep.subr.bf16.mxu1 %v2875_v12  ;;  %v1360_v40 = vpop.permute.xlu1 %1359 }
 0x745   :  { %v1358_v39 = vpop.permute.xlu0 %1357 }
 0x747   :  { %2878 = vmatpush3.bf16.msra.mxu1 %v2875_v12 }
 0x748   :  { %2881 = vmatprep.subr.msk.bf16.mxu1 %vm3757_vm1, %v2879_v22  ;;  %v3144_v23 = vpop.eup %3143 }
 0x749   :  { %v3146_v34 = vpop.eup %3145 }
 0x74a   :  { %2766 = vmatmul.mubr.msk.f32.vlgmr.msra.gmra.mrb[12].mxu1 %vm558_vm0, %v3142_v18 }
 0x74b   :  { %2768 = vmatprep.mubr.msk.f32.mxu1 %vm558_vm0, %v3144_v23 }
 0x74e   :  { %2769 = vmatmul.mubr.msk.f32.gmra.mrb[14].mxu1 %vm558_vm0, %v3146_v34 }
 0x74f   :  { %2779 = vmatprep.mubr.msk.f32.mxu1 %vm558_vm0, %v1354_v36 }
 0x750   :  { %2884 = vmatpush3.bf16.xpose.msk.msra.mxu1 %vm3757_vm1, %v2879_v22 }
 0x751   :  { %2887 = vmatprep.subr.msk.bf16.mxu1 %vm3757_vm1, %v2885_v37 }
 0x758   :  { %2890 = vmatpush3.bf16.xpose.msk.msra.mxu1 %vm3757_vm1, %v2885_v37 }
 0x75f   :  { %2780 = vmatmul.mubr.msk.f32.vlgmr.msra.gmra.mrb[16].mxu1 %vm558_vm0, %v1356_v38 }
 0x760   :  { %2782 = vmatprep.mubr.msk.f32.mxu1 %vm558_vm0, %v1358_v39 }
 0x763   :  { %2783 = vmatmul.mubr.msk.f32.gmra.mrb[18].mxu1 %vm558_vm0, %v1360_v40 }
 0x764   :  { %2069 = vmatprep.mubr.bf16.mxu1 %v3480_v30 }
 0x81d   :  { %v3961_v42 = vpop.f32.mrb[12].mxu1 }
 0x81e   :  { %v3963_v43 = vpop.f32.mrb[13].mxu1 }
 0x821   :  { %v3965_v44 = vpop.f32.mrb[14].mxu1 }
 0x822   :  { %v3967_v46 = vpop.f32.mrb[15].mxu1 }
 0x832   :  { %v2781_v41 = vpop.f32.mrb[16].mxu1 }
 0x833   :  { %v1457_v47 = vadd.f32 %v2781_v41, %v3793_v25  ;;  %v1451_v45 = vpop.f32.mrb[17].mxu1  ;;  %v695_v41 = vsel %vm558_vm0, %v3823_v63, 0.0  ;;  %v698_v63 = vsel %vm558_vm0, %v3835_v6, 0.0 }
 0x834   :  { %v1452_v48 = vadd.f32 %v1451_v45, %v3795_v26  ;;  %v950_v26 = vsel %vm558_vm0, %v3881_v56, 0.0  ;;  %v1224_v56 = vsel %vm558_vm0, %v3941_v1, 0.0  ;;  %v701_v45 = vsel %vm558_vm0, %v3837_v9, 0.0 }
 0x835   :  { %v1473_v49 = vsel %vm558_vm0, %v1457_v47, -inf }
 0x836   :  { %1474 = vmax.xlane.f32.xlu1 %v1473_v49  ;;  %v2784_v2 = vpop.f32.mrb[18].mxu1  ;;  %v1470_v50 = vsel %vm558_vm0, %v1452_v48, -inf }
 0x837   :  { %v1467_v19 = vadd.f32 %v2784_v2, %v3801_v33  ;;  %v1461_v51 = vpop.f32.mrb[19].mxu1  ;;  %1471 = vmax.xlane.f32.xlu0 %v1470_v50  ;;  %v959_v33 = vsel %vm558_vm0, %v3895_v20, 0.0  ;;  %v1230_v20 = vsel %vm558_vm0, %v3144_v23, 0.0 }
 0x838   :  { %v1462_v53 = vadd.f32 %v1461_v51, %v3803_v35  ;;  %v1227_v35 = vsel %vm558_vm0, %v3142_v18, 0.0 }
 0x839   :  { %v1479_v52 = vsel %vm558_vm0, %v1467_v19, -inf }
 0x83a   :  { %v1476_v25 = vsel %vm558_vm0, %v1462_v53, -inf }
 0x83b   :  { %1480 = vmax.xlane.f32.xlu0 %v1479_v52 }
 0x83f   :  { %1477 = vmax.xlane.f32.xlu0 %v1476_v25 }
 0x847   :  { %2977 = vrot.lane.b32.xlu1 %v3725_v5, %s3483_s6  ;;  %v1233_v5 = vsel %vm558_vm0, %v3146_v34, 0.0 }
 0x855   :  { %2972 = vrot.lane.b32.xlu0 %v3727_v7, %s3483_s6  ;;  %v956_v7 = vsel %vm558_vm0, %v3889_v11, 0.0 }
 0x86b   :  { %951 = vadd.xlane.f32.xlu1 %v950_v26 }
 0x86f   :  { %960 = vadd.xlane.f32.xlu1 %v959_v33 }
 0x873   :  { %1228 = vadd.xlane.f32.xlu1 %v1227_v35 }
 0x874   :  { %954 = vadd.xlane.f32.xlu0 %v953_v54 }
 0x877   :  { %1234 = vadd.xlane.f32.xlu1 %v1233_v5 }
 0x878   :  { %957 = vadd.xlane.f32.xlu0 %v956_v7 }
 0x87c   :  { %1225 = vadd.xlane.f32.xlu0 %v1224_v56 }
 0x880   :  { %1231 = vadd.xlane.f32.xlu0 %v1230_v20 }
 0x8c3   :  { %v1475_v55 = vpop.xlane.xlu1 %1474 }
 0x8c4   :  { %v1483_v8 = vsub.f32 %v1457_v47, %v1475_v55  ;;  %v1472_v57 = vpop.xlane.xlu0 %1471 }
 0x8c5   :  { %v1482_v58 = vsub.f32 %v1452_v48, %v1472_v57  ;;  %v692_v48 = vsel %vm558_vm0, %v3821_v62, 0.0 }
 0x8c6   :  { %v1488_v60 = vmul.f32 1.442695, %v1483_v8 }
 0x8c7   :  { %v1486_v3 = vmul.f32 1.442695, %v1482_v58  ;;  %v2978_v4 = vpop.permute.xlu1 %2977 }
 0x8c8   :  { %3147 = vpow2.f32 %v1488_v60  ;;  %v1481_v59 = vpop.xlane.xlu0 %1480  ;;  %v2980_v13 = vunpack.i.h.bf16 %v2978_v4  ;;  %v2979_v22 = vunpack.i.l.bf16 %v2978_v4 }
 0x8c9   :  { %3149 = vpow2.f32 %v1486_v3  ;;  %v1485_v24 = vsub.f32 %v1467_v19, %v1481_v59  ;;  %v3044_v59 = vld [vmem:[#allocation13 + $0x8] sm:$0xff]  }
 0x8ca   :  { %v2895_v37 = vpack.c.bf16 %v2980_v13, %v2979_v22 }
 0x8cb   :  { %v1492_v61 = vmul.f32 1.442695, %v1485_v24  ;;  %v3047_v24 = vld [vmem:[#allocation13 + $0x20] sm:$0xff]  }
 0x8cc   :  { %v1478_v11 = vpop.xlane.xlu0 %1477 }
 0x8cd   :  { %3151 = vpow2.f32 %v1492_v61  ;;  %v1484_v12 = vsub.f32 %v1462_v53, %v1478_v11 }
 0x8cf   :  { %v1490_v1 = vmul.f32 1.442695, %v1484_v12  ;;  %v3049_v12 = vld [vmem:[#allocation13 + $0x30] sm:$0xff]  }
 0x8d0   :  { %v2973_v21 = vpop.permute.xlu0 %2972 }
 0x8d1   :  { %3153 = vpow2.f32 %v1490_v1  ;;  %v2975_v0 = vunpack.i.h.bf16 %v2973_v21  ;;  %v2974_v18 = vunpack.i.l.bf16 %v2973_v21  ;;  %v3050_v1 = vld [vmem:[#allocation13 + $0x38] sm:$0xff]  }
 0x8d2   :  { %v3148_v23 = vpop.eup %3147 }
 0x8d3   :  { %v3150_v31 = vpop.eup %3149  ;;  %v2891_v32 = vpack.c.bf16 %v2975_v0, %v2974_v18  ;;  %v1497_v34 = vsel %vm558_vm0, %v3148_v23, 0.0 }
 0x8d4   :  { %1498 = vadd.xlane.f32.xlu1 %v1497_v34  ;;  %2793 = vmatprep.mubr.msk.f32.mxu0 %vm558_vm0, %v3150_v31  ;;  %v1494_v36 = vsel %vm558_vm0, %v3150_v31, 0.0 }
 0x8d5   :  { %1495 = vadd.xlane.f32.xlu0 %v1494_v36  ;;  %2892 = vmatprep.subr.bf16.mxu0 %v2891_v32 }
 0x8d6   :  { %2894 = vmatpush3.bf16.msra.mxu0 %v2891_v32 }
 0x8d7   :  { %v3152_v38 = vpop.eup %3151  ;;  %2896 = vmatprep.subr.bf16.mxu0 %v2895_v37 }
 0x8d8   :  { %v1503_v39 = vsel %vm558_vm0, %v3152_v38, 0.0 }
 0x8d9   :  { %1504 = vadd.xlane.f32.xlu1 %v1503_v39 }
 0x8da   :  { %2898 = vmatpush3.bf16.msra.mxu0 %v2895_v37 }
 0x8db   :  { %v3154_v40 = vpop.eup %3153 }
 0x8dc   :  { %v1500_v47 = vsel %vm558_vm0, %v3154_v40, 0.0 }
 0x8dd   :  { %696 = vadd.xlane.f32.xlu1 %v695_v41  ;;  %1501 = vadd.xlane.f32.xlu0 %v1500_v47 }
 0x8de   :  { %2794 = vmatmul.mubr.msk.f32.vlgmr.msra.gmra.mrb[20].mxu0 %vm558_vm0, %v3148_v23 }
 0x8df   :  { %2796 = vmatprep.mubr.msk.f32.mxu0 %vm558_vm0, %v3154_v40 }
 0x8e1   :  { %702 = vadd.xlane.f32.xlu1 %v701_v45  ;;  %693 = vadd.xlane.f32.xlu0 %v692_v48 }
 0x8e2   :  { %2797 = vmatmul.mubr.msk.f32.gmra.mrb[22].mxu0 %vm558_vm0, %v3152_v38 }
 0x8e5   :  { %699 = vadd.xlane.f32.xlu0 %v698_v63 }
 0x8f8   :  { %v952_v49 = vpop.xlane.xlu1 %951 }
 0x8f9   :  { %3155 = vrcp.f32 %v952_v49 }
 0x8fc   :  { %v961_v2 = vpop.xlane.xlu1 %960 }
 0x900   :  { %v1229_v19 = vpop.xlane.xlu1 %1228 }
 0x901   :  { %v955_v50 = vpop.xlane.xlu0 %954 }
 0x902   :  { %3157 = vrcp.f32 %v955_v50 }
 0x903   :  { %3159 = vrcp.f32 %v961_v2  ;;  %v3156_v52 = vpop.eup %3155 }
 0x904   :  { %v1235_v9 = vpop.xlane.xlu1 %1234  ;;  %v1079_v6 = vmul.f32 %v3156_v52, %v3911_v27 }
 0x905   :  { %v958_v51 = vpop.xlane.xlu0 %957 }
 0x906   :  { %3161 = vrcp.f32 %v958_v51 }
 0x907   :  { %3163 = vrcp.f32 %v1229_v19 }
 0x909   :  { %v1226_v62 = vpop.xlane.xlu0 %1225 }
 0x90a   :  { %3165 = vrcp.f32 %v1226_v62 }
 0x90b   :  { %3167 = vrcp.f32 %v1235_v9 }
 0x90c   :  { %v3158_v53 = vpop.eup %3157 }
 0x90d   :  { %v1232_v25 = vpop.xlane.xlu0 %1231  ;;  %v1080_v26 = vmul.f32 %v3158_v53, %v3909_v10  ;;  %v3160_v33 = vpop.eup %3159 }
 0x90e   :  { %3169 = vrcp.f32 %v1232_v25  ;;  %v1082_v7 = vmul.f32 %v3160_v33, %v3913_v28  ;;  %v3043_v28 = vld [vmem:[#allocation13] sm:$0xff]  }
 0x90f   :  { %v2981_v35 = vpack.i.bf16 %v1080_v26, %v1079_v6  ;;  %2799 = vmatprep.subr.bf16.mxu0 %v3043_v28 }
 0x910   :  { %v3162_v54 = vpop.eup %3161  ;;  %2800 = vmatpush3.bf16.msra.mxu0 %v3043_v28 }
 0x911   :  { %2982 = vrot.lane.b32.xlu0 %v2981_v35, %s3483_s6  ;;  %v1081_v5 = vmul.f32 %v3162_v54, %v3915_v29  ;;  %v3164_v56 = vpop.eup %3163  ;;  %2801 = vmatprep.subr.bf16.mxu0 %v3044_v59 }
 0x912   :  { %v1350_v27 = vmul.f32 %v3164_v56, %v3961_v42  ;;  %v3046_v42 = vld [vmem:[#allocation13 + $0x18] sm:$0xff]  }
 0x913   :  { %v2986_v20 = vpack.i.bf16 %v1082_v7, %v1081_v5 }
 0x914   :  { %v3166_v55 = vpop.eup %3165  ;;  %2802 = vmatpush3.bf16.msra.mxu0 %v3044_v59 }
 0x915   :  { %2987 = vrot.lane.b32.xlu1 %v2986_v20, %s3483_s6  ;;  %v1349_v8 = vmul.f32 %v3166_v55, %v3963_v43  ;;  %v3168_v10 = vpop.eup %3167  ;;  %v3045_v43 = vld [vmem:[#allocation13 + $0x10] sm:$0xff]  }
 0x916   :  { %v1352_v29 = vmul.f32 %v3168_v10, %v3965_v44  ;;  %2803 = vmatprep.subr.bf16.mxu0 %v3045_v43 }
 0x917   :  { %v2991_v57 = vpack.i.bf16 %v1350_v27, %v1349_v8 }
 0x918   :  { %v3170_v58 = vpop.eup %3169  ;;  %2804 = vmatpush3.bf16.msra.mxu0 %v3045_v43 }
 0x919   :  { %2992 = vrot.lane.b32.xlu1 %v2991_v57, %s3477_s4  ;;  %v1351_v60 = vmul.f32 %v3170_v58, %v3967_v46  ;;  %2805 = vmatprep.subr.bf16.mxu0 %v3046_v42  ;;  %v3048_v46 = vld [vmem:[#allocation13 + $0x28] sm:$0xff]  }
 0x91b   :  { %v2996_v3 = vpack.i.bf16 %v1352_v29, %v1351_v60 }
 0x91c   :  { %2806 = vmatpush3.bf16.msra.mxu0 %v3046_v42 }
 0x91d   :  { %2997 = vrot.lane.b32.xlu1 %v2996_v3, %s3477_s4  ;;  %2807 = vmatprep.subr.bf16.mxu0 %v3047_v24 }
 0x920   :  { %2808 = vmatpush3.bf16.msra.mxu0 %v3047_v24 }
 0x921   :  { %2809 = vmatprep.subr.bf16.mxu0 %v3048_v46 }
 0x924   :  { %2810 = vmatpush3.bf16.msra.mxu0 %v3048_v46 }
 0x925   :  { %2811 = vmatprep.subr.bf16.mxu0 %v3049_v12 }
 0x928   :  { %2812 = vmatpush3.bf16.msra.mxu0 %v3049_v12  ;;  %v3056_v12 = vld [vmem:[#allocation14 + $0xc] ss:$16 sps:$4 sm:$0xff]  }
 0x929   :  { %2813 = vmatprep.subr.bf16.mxu0 %v3050_v1 }
 0x92c   :  { %2814 = vmatpush3.bf16.msra.mxu0 %v3050_v1  ;;  %v3059_v1 = vld [vmem:[#allocation14 + $0x24] ss:$16 sps:$4 sm:$0xff]  }
 0x92d   :  { %2090 = vmatprep.subr.bf16.mxu0 %v3056_v12 }
 0x961   :  { %v1499_v44 = vpop.xlane.xlu1 %1498 }
 0x962   :  { %v1496_v61 = vpop.xlane.xlu0 %1495  ;;  %3171 = vrcp.f32 %v1499_v44 }
 0x963   :  { %3173 = vrcp.f32 %v1496_v61  ;;  %v3051_v61 = vld [vmem:[#allocation14] ss:$16 sps:$4 sm:$0xff]  }
 0x966   :  { %v1505_v11 = vpop.xlane.xlu1 %1504 }
 0x967   :  { %3175 = vrcp.f32 %v1505_v11  ;;  %v3053_v11 = vld [vmem:[#allocation14 + $0x4] ss:$16 sps:$4 sm:$0xff]  }
 0x968   :  { %2037 = vmatprep.subr.bf16.mxu1 %v3053_v11 }
 0x969   :  { %2038 = vmatpush1.bf16.msra.mxu1 %v3051_v61  ;;  %v2498_v61 = vld [vmem:[%s4093_s8] ss:$0 sm:$0xff]  ;;  %s3484_s8 = smov [#allocation17]  }
 0x96a   :  { %v1502_v4 = vpop.xlane.xlu0 %1501  ;;  %v697_v41 = vpop.xlane.xlu1 %696  ;;  %2039 = vmatprep.subr.bf16.mxu1 %v3059_v1  ;;  %s2401_s15 = sshll.u32 %s3484_s8, 4  ;;  %s2402_s15 = int_to_ptr.vmem [resolvable:$true] %s2401_s15 }
 0x96b   :  { %3177 = vrcp.f32 %v1502_v4  ;;  %v3054_v4 = vld [vmem:[#allocation14 + $0x8] ss:$16 sps:$4 sm:$0xff]   ;;  %s3429_s3 = scalar_lea.vmem %s2402_s15, 512  ;;  %p3434_p3 = scmp.lt.s32.totalorder %s2402_s15, %s2402_s15 }
 0x96c   :  { %v3172_v13 = vpop.eup %3171  ;;  %3179 = vrcp.f32 %v697_v41  ;;  %p3430_p2 = scmp.ne.s32.totalorder %s2402_s15, %s3429_s3  ;;  %p3435_p4 = scmp.lt.s32.totalorder %s3429_s3, %s3429_s3 }
 0x96d   :  { %v3174_v22 = vpop.eup %3173 }
 0x96e   :  { %v694_v47 = vpop.xlane.xlu0 %693  ;;  %v703_v45 = vpop.xlane.xlu1 %702  ;;  %p3436_p5 = por %p3435_p4, %p3434_p3 }
 0x96f   :  { %3181 = vrcp.f32 %v694_v47  ;;  %v3229_v47 = vld [vmem:[#allocation2 + $0x8] sm:$0xff] }
 0x970   :  { %3183 = vrcp.f32 %v703_v45  ;;  %p3437_p6 = pnand %p3436_p5, %p3430_p2 }
 0x971   :  { %v3176_v31 = vpop.eup %3175 }
 0x972   :  { %v700_v48 = vpop.xlane.xlu0 %699 }
 0x973   :  { %3185 = vrcp.f32 %v700_v48 }
 0x975   :  { %v3178_v36 = vpop.eup %3177 }
 0x976   :  { %v3180_v50 = vpop.eup %3179 }
 0x977   :  { %v806_v52 = vmul.f32 %v3180_v50, %v3849_v14 }
 0x979   :  { %v3182_v19 = vpop.eup %3181 }
 0x97a   :  { %v805_v62 = vmul.f32 %v3182_v19, %v3851_v15  ;;  %v3184_v6 = vpop.eup %3183 }
 0x97b   :  { %v808_v10 = vmul.f32 %v3184_v6, %v3853_v16  ;;  %v3075_v6 = vld [vmem:[#allocation14 + $0x80] ss:$16 sps:$4 sm:$0xff]  }
 0x97d   :  { %v3186_v33 = vpop.eup %3185 }
 0x97e   :  { %v807_v57 = vmul.f32 %v3186_v33, %v3855_v17  ;;  %v3083_v33 = vld [vmem:[#allocation14 + $0xa4] ss:$16 sps:$4 sm:$0xff]  }
 0x983   :  { %v2983_v49 = vpop.permute.xlu0 %2982 }
 0x984   :  { %v2985_v51 = vunpack.i.h.bf16 %v2983_v49  ;;  %v2984_v9 = vunpack.i.l.bf16 %v2983_v49  ;;  %v3230_v49 = vld [vmem:[#allocation2 + $0x18] sm:$0xff] }
 0x986   :  { %v1672_v35 = vsel %vm558_vm0, %v806_v52, %v2985_v51  ;;  %v1671_v54 = vsel %vm558_vm0, %v805_v62, %v2984_v9  ;;  %v3071_v51 = vld [vmem:[#allocation14 + $0x64] ss:$16 sps:$4 sm:$0xff]   ;;  %v3074_v9 = vld [vmem:[#allocation14 + $0x6c] ss:$16 sps:$4 sm:$0xff]   ;;  %v3069_v62 = vld [vmem:[#allocation14 + $0x60] ss:$16 sps:$4 sm:$0xff]  }
 0x987   :  { %v2988_v63 = vpop.permute.xlu1 %2987  ;;  %v3072_v52 = vld [vmem:[#allocation14 + $0x68] ss:$16 sps:$4 sm:$0xff]  }
 0x988   :  { %v2990_v7 = vunpack.i.h.bf16 %v2988_v63  ;;  %v2989_v56 = vunpack.i.l.bf16 %v2988_v63 }
 0x98a   :  { %v1674_v28 = vsel %vm558_vm0, %v808_v10, %v2990_v7  ;;  %v1673_v59 = vsel %vm558_vm0, %v807_v57, %v2989_v56  ;;  %v3089_v7 = vld [vmem:[#allocation14 + $0xc4] ss:$16 sps:$4 sm:$0xff]   ;;  %v3092_v56 = vld [vmem:[#allocation14 + $0xcc] ss:$16 sps:$4 sm:$0xff]  }
 0x98b   :  { %v2993_v2 = vpop.permute.xlu1 %2992 }
 0x98c   :  { %v2995_v53 = vunpack.i.h.bf16 %v2993_v2  ;;  %v2994_v25 = vunpack.i.l.bf16 %v2993_v2 }
 0x98e   :  { %v1676_v15 = vsel %vm1675_vm2, %v1671_v54, %v2994_v25  ;;  %v1677_v14 = vsel %vm1675_vm2, %v1672_v35, %v2995_v53  ;;  %v3077_v53 = vld [vmem:[#allocation14 + $0x84] ss:$16 sps:$4 sm:$0xff]   ;;  %v3080_v25 = vld [vmem:[#allocation14 + $0x8c] ss:$16 sps:$4 sm:$0xff]   ;;  %v3081_v54 = vld [vmem:[#allocation14 + $0xa0] ss:$16 sps:$4 sm:$0xff]  }
 0x98f   :  { %v2998_v26 = vpop.permute.xlu1 %2997  ;;  %v3086_v35 = vld [vmem:[#allocation14 + $0xac] ss:$16 sps:$4 sm:$0xff]  }
 0x990   :  { %v3000_v8 = vunpack.i.h.bf16 %v2998_v26  ;;  %v2999_v27 = vunpack.i.l.bf16 %v2998_v26  ;;  %v3078_v26 = vld [vmem:[#allocation14 + $0x88] ss:$16 sps:$4 sm:$0xff]  }
 0x992   :  { %v1679_v24 = vsel %vm1675_vm2, %v1674_v28, %v3000_v8  ;;  %v1678_v46 = vsel %vm1675_vm2, %v1673_v59, %v2999_v27  ;;  %v3093_v8 = vld [vmem:[#allocation14 + $0xe0] ss:$16 sps:$4 sm:$0xff]   ;;  %v3096_v27 = vld [vmem:[#allocation14 + $0xe8] ss:$16 sps:$4 sm:$0xff]  }
 0x9b1   :  { %v2795_v21 = vpop.f32.mrb[20].mxu0 }
 0x9b2   :  { %v1620_v0 = vmul.f32 %v3172_v13, %v2795_v21  ;;  %v1596_v18 = vpop.f32.mrb[21].mxu0  ;;  %v3062_v13 = vld [vmem:[#allocation14 + $0x2c] ss:$16 sps:$4 sm:$0xff]   ;;  %v3057_v21 = vld [vmem:[#allocation14 + $0x20] ss:$16 sps:$4 sm:$0xff]  }
 0x9b3   :  { %v1619_v23 = vmul.f32 %v3174_v22, %v1596_v18  ;;  %v3060_v22 = vld [vmem:[#allocation14 + $0x28] ss:$16 sps:$4 sm:$0xff]   ;;  %v3068_v18 = vld [vmem:[#allocation14 + $0x4c] ss:$16 sps:$4 sm:$0xff]   ;;  %2040 = vmatpush1.bf16.msra.mxu1 %v3057_v21 }
 0x9b5   :  { %v3001_v32 = vpack.i.bf16 %v1620_v0, %v1619_v23  ;;  %v2798_v34 = vpop.f32.mrb[22].mxu0  ;;  %v3065_v0 = vld [vmem:[#allocation14 + $0x44] ss:$16 sps:$4 sm:$0xff]   ;;  %v3063_v23 = vld [vmem:[#allocation14 + $0x40] ss:$16 sps:$4 sm:$0xff]  }
 0x9b6   :  { %v1622_v37 = vmul.f32 %v3176_v31, %v2798_v34  ;;  %v1606_v38 = vpop.f32.mrb[23].mxu0  ;;  %2041 = vmatprep.subr.bf16.mxu1 %v3065_v0  ;;  %v3066_v31 = vld [vmem:[#allocation14 + $0x48] ss:$16 sps:$4 sm:$0xff]  }
 0x9b7   :  { %v1621_v39 = vmul.f32 %v3178_v36, %v1606_v38  ;;  %3002 = vrot.lane.b32.xlu0 %v3001_v32, %s3482_s25  ;;  %2042 = vmatpush1.bf16.msra.mxu1 %v3063_v23  ;;  %v3227_v36 = vld [vmem:[#allocation2] sm:$0xff] }
 0x9b8   :  { %2043 = vmatprep.subr.bf16.mxu1 %v3071_v51  ;;  %v3112_v51 = vld [vmem:[#allocation16 + $0x30] sm:$0xff]  }
 0x9b9   :  { %v3006_v40 = vpack.i.bf16 %v1622_v37, %v1621_v39 }
 0x9bb   :  { %3007 = vrot.lane.b32.xlu1 %v3006_v40, %s3482_s25  ;;  %v3228_v40 = vld [vmem:[#allocation2 + $0x10] sm:$0xff]  ;;  %2044 = vmatpush1.bf16.msra.mxu1 %v3069_v62  ;;  %v3114_v62 = vld [vmem:[#allocation16 + $0x38] sm:$0xff]  }
 0x9bc   :  { %2045 = vmatprep.subr.bf16.mxu1 %v3077_v53 }
 0x9bf   :  { %2046 = vmatpush1.bf16.msra.mxu1 %v3075_v6 }
 0x9c0   :  { %2047 = vmatprep.subr.bf16.mxu1 %v3083_v33 }
 0x9c3   :  { %2048 = vmatpush1.bf16.msra.mxu1 %v3081_v54 }
 0x9c4   :  { %2049 = vmatprep.subr.bf16.mxu1 %v3089_v7 }
 0xa29   :  { %v3003_v5 = vpop.permute.xlu0 %3002 }
 0xa2a   :  { %v3005_v20 = vunpack.i.h.bf16 %v3003_v5  ;;  %v3004_v55 = vunpack.i.l.bf16 %v3003_v5  ;;  %v3084_v5 = vld [vmem:[#allocation14 + $0xa8] ss:$16 sps:$4 sm:$0xff]  }
 0xa2c   :  { %v1681_v58 = vsel %vm1680_vm3, %v1676_v15, %v3004_v55  ;;  %v1682_v60 = vsel %vm1680_vm3, %v1677_v14, %v3005_v20  ;;  %v3087_v20 = vld [vmem:[#allocation14 + $0xc0] ss:$16 sps:$4 sm:$0xff]   ;;  %v3090_v55 = vld [vmem:[#allocation14 + $0xc8] ss:$16 sps:$4 sm:$0xff]   ;;  %v3095_v15 = vld [vmem:[#allocation14 + $0xe4] ss:$16 sps:$4 sm:$0xff]  }
 0xa2d   :  { %v3008_v29 = vpop.permute.xlu1 %3007  ;;  %v1685_v3 = vpack.c.bf16 %v1682_v60, %v1681_v58  ;;  %2050 = vmatpush1.bf16.msra.mxu1 %v3087_v20  ;;  %v3098_v14 = vld [vmem:[#allocation14 + $0xec] ss:$16 sps:$4 sm:$0xff]  }
 0xa2e   :  { %v3010_v43 = vunpack.i.h.bf16 %v3008_v29  ;;  %v3009_v42 = vunpack.i.l.bf16 %v3008_v29  ;;  %2051 = vmatprep.subr.bf16.mxu1 %v3095_v15 }
 0xa2f   :  { %2815 = vmatprep.mubr.bf16.mxu0 %v1685_v3 }
 0xa30   :  { %v1684_v16 = vsel %vm1680_vm3, %v1679_v24, %v3010_v43  ;;  %v1683_v17 = vsel %vm1680_vm3, %v1678_v46, %v3009_v42 }
 0xa31   :  { %v1686_v44 = vpack.c.bf16 %v1684_v16, %v1683_v17  ;;  %2052 = vmatpush1.bf16.msra.mxu1 %v3093_v8 }
 0xa33   :  { %2816 = vmatmul.mubr.bf16.vlgmr.msra.gmra.mrb[24].mxu0 %v1686_v44 }
 0xa34   :  { %2122 = vmatprep.mubr.bf16.mxu0 %v3480_v30  ;;  %2091 = vmatpush1.bf16.msra.mxu0 %v3054_v4 }
 0xa35   :  { %2092 = vmatprep.subr.bf16.mxu0 %v3062_v13 }
 0xa38   :  { %2093 = vmatpush1.bf16.msra.mxu0 %v3060_v22 }
 0xa39   :  { %2094 = vmatprep.subr.bf16.mxu0 %v3068_v18 }
 0xa3c   :  { %2095 = vmatpush1.bf16.msra.mxu0 %v3066_v31 }
 0xa3d   :  { %2096 = vmatprep.subr.bf16.mxu0 %v3074_v9  ;;  %v3113_v9 = vld [vmem:[#allocation16 + $0x78] sm:$0xff]  }
 0xa40   :  { %2097 = vmatpush1.bf16.msra.mxu0 %v3072_v52 }
 0xa41   :  { %2098 = vmatprep.subr.bf16.mxu0 %v3080_v25 }
 0xa44   :  { %2099 = vmatpush1.bf16.msra.mxu0 %v3078_v26 }
 0xa45   :  { %2100 = vmatprep.subr.bf16.mxu0 %v3086_v35 }
 0xa48   :  { %2101 = vmatpush1.bf16.msra.mxu0 %v3084_v5 }
 0xa49   :  { %2102 = vmatprep.subr.bf16.mxu0 %v3092_v56 }
 0xa4c   :  { %2103 = vmatpush1.bf16.msra.mxu0 %v3090_v55 }
 0xa4d   :  { %2104 = vmatprep.subr.bf16.mxu0 %v3098_v14 }
 0xa50   :  { %2105 = vmatpush1.bf16.msra.mxu0 %v3096_v27 }
 0xb06   :  { %v2817_v32 = vpop.f32.mrb[24].mxu0 }
 0xb07   :  { %v1785_v34 = vpop.f32.mrb[25].mxu0  ;;  %v4043_v41 = vadd.f32 %v3228_v40, %v2817_v32  ;;  %v3099_v32 = vld [vmem:[#allocation16 + $0x40] sm:$0xff]   ;;  %v3104_v40 = vld [vmem:[#allocation16 + $0x10] sm:$0xff]  }
 0xb08   :  { %v4041_v37 = vadd.f32 %v3227_v36, %v1785_v34  ;;  %v2818_v38 = vpop.f32.mrb[26].mxu0  ;;  %v3100_v34 = vld [vmem:[#allocation16] sm:$0xff]   ;;  %2639 = vmatprep.subr.bf16.mxu1 %v3099_v32  ;;  %v3101_v36 = vld [vmem:[#allocation16 + $0x48] sm:$0xff]  }
 0xb09   :  { %v1788_v39 = vpop.f32.mrb[27].mxu0  ;;  %v4051_v2 = vadd.f32 %v3230_v49, %v2818_v38  ;;  %v1807_v50 = vmul.f32 %v4043_v41, %v4043_v41  ;;  %v3102_v38 = vld [vmem:[#allocation16 + $0x8] sm:$0xff]  }
 0xb0a   :  { %v4045_v45 = vadd.f32 %v3229_v47, %v1788_v39  ;;  %v1805_v48 = vmul.f32 %v4041_v37, %v4041_v37  ;;  %v3103_v39 = vld [vmem:[#allocation16 + $0x50] sm:$0xff]   ;;  %v3105_v47 = vld [vmem:[#allocation16 + $0x58] sm:$0xff]   ;;  %v3109_v49 = vld [vmem:[#allocation16 + $0x68] sm:$0xff]  }
 0xb0b   :  { %v1808_v19 = vmul.f32 %v4051_v2, %v4051_v2 }
 0xb0c   :  { %1809 = vadd.xlane.f32.xlu0 %v1805_v48  ;;  %v1806_v63 = vmul.f32 %v4045_v45, %v4045_v45  ;;  %v3106_v48 = vld [vmem:[#allocation16 + $0x18] sm:$0xff]  }
 0xb0e   :  { %1811 = vadd.xlane.f32.xlu1 %v1806_v63  ;;  %v3108_v63 = vld [vmem:[#allocation16 + $0x20] sm:$0xff]  }
 0xb10   :  { %1813 = vadd.xlane.f32.xlu0 %v1807_v50  ;;  %v3110_v50 = vld [vmem:[#allocation16 + $0x28] sm:$0xff]  }
 0xb14   :  { %1815 = vadd.xlane.f32.xlu0 %v1808_v19  ;;  %v3111_v19 = vld [vmem:[#allocation16 + $0x70] sm:$0xff]  }
 0xb99   :  { %v1810_v10 = vpop.xlane.xlu0 %1809 }
 0xb9a   :  { %v1817_v57 = vmul.f32 0.0078125, %v1810_v10 }
 0xb9b   :  { %v1812_v58 = vpop.xlane.xlu1 %1811 }
 0xb9c   :  { %v1821_v60 = vadd.f32 1e-06, %v1817_v57  ;;  %v1818_v29 = vmul.f32 0.0078125, %v1812_v58 }
 0xb9d   :  { %v1814_v3 = vpop.xlane.xlu0 %1813 }
 0xb9e   :  { %3187 = vrsqrt.f32 %v1821_v60  ;;  %v1822_v28 = vadd.f32 1e-06, %v1818_v29  ;;  %v1819_v59 = vmul.f32 0.0078125, %v1814_v3 }
 0xba0   :  { %3189 = vrsqrt.f32 %v1822_v28  ;;  %v1823_v43 = vadd.f32 1e-06, %v1819_v59 }
 0xba1   :  { %v1816_v42 = vpop.xlane.xlu0 %1815 }
 0xba2   :  { %v1820_v24 = vmul.f32 0.0078125, %v1816_v42  ;;  %3191 = vrsqrt.f32 %v1823_v43 }
 0xba4   :  { %v1824_v46 = vadd.f32 1e-06, %v1820_v24 }
 0xba6   :  { %3193 = vrsqrt.f32 %v1824_v46 }
 0xba8   :  { %v3188_v16 = vpop.eup %3187 }
 0xba9   :  { %v1829_v17 = vmul.f32 %v3188_v16, %v4041_v37 }
 0xbaa   :  { %v3190_v44 = vpop.eup %3189 }
 0xbab   :  { %v1830_v11 = vmul.f32 %v3190_v44, %v4045_v45  ;;  %v1839_v12 = vmul.f32 %v2498_v61, %v1829_v17 }
 0xbac   :  { %v3192_v1 = vpop.eup %3191 }
 0xbad   :  { %v1840_v4 = vmul.f32 %v2498_v61, %v1830_v11  ;;  %v1831_v22 = vmul.f32 %v3192_v1, %v4043_v41 }
 0xbaf   :  { %v1843_v13 = vpack.c.bf16 %v1840_v4, %v1839_v12  ;;  %v1841_v23 = vmul.f32 %v2498_v61, %v1831_v22 }
 0xbb0   :  { %v3194_v21 = vpop.eup %3193 }
 0xbb1   :  { %2070 = vmatmul.mubr.bf16.vlgmr.msra.gmra.mrb[20].mxu1 %v1843_v13  ;;  %2123 = vmatmul.mubr.bf16.vlgmr.msra.gmra.mrb[28].mxu0 %v1843_v13  ;;  %v1832_v0 = vmul.f32 %v3194_v21, %v4051_v2 }
 0xbb2   :  { %2079 = vmatprep.mubr.bf16.mxu1 %v3480_v30  ;;  %2132 = vmatprep.mubr.bf16.mxu0 %v3480_v30  ;;  %v3107_v30 = vld [vmem:[#allocation16 + $0x60] sm:$0xff]  }
 0xbb3   :  { %v1842_v18 = vmul.f32 %v2498_v61, %v1832_v0  ;;  %2640 = vmatpush3.bf16.msra.mxu1 %v3100_v34 }
 0xbb4   :  { %2641 = vmatprep.subr.bf16.mxu1 %v3101_v36 }
 0xbb5   :  { %v1844_v31 = vpack.c.bf16 %v1842_v18, %v1841_v23 }
 0xbb7   :  { %2642 = vmatpush3.bf16.msra.mxu1 %v3102_v38 }
 0xbb8   :  { %2643 = vmatprep.subr.bf16.mxu1 %v3103_v39 }
 0xbb9   :  { %2080 = vmatmul.mubr.bf16.gmra.mrb[24].mxu1 %v1844_v31  ;;  %2133 = vmatmul.mubr.bf16.gmra.mrb[32].mxu0 %v1844_v31 }
 0xbbb   :  { %2644 = vmatpush3.bf16.msra.mxu1 %v3104_v40 }
 0xbbc   :  { %2645 = vmatprep.subr.bf16.mxu1 %v3105_v47 }
 0xbbf   :  { %2646 = vmatpush3.bf16.msra.mxu1 %v3106_v48 }
 0xbc0   :  { %2647 = vmatprep.subr.bf16.mxu1 %v3107_v30 }
 0xbc3   :  { %2648 = vmatpush3.bf16.msra.mxu1 %v3108_v63 }
 0xbc4   :  { %2649 = vmatprep.subr.bf16.mxu1 %v3109_v49 }
 0xbc7   :  { %2650 = vmatpush3.bf16.msra.mxu1 %v3110_v50 }
 0xbc8   :  { %2651 = vmatprep.subr.bf16.mxu1 %v3111_v19 }
 0xbcb   :  { %2652 = vmatpush3.bf16.msra.mxu1 %v3112_v51 }
 0xbcc   :  { %2653 = vmatprep.subr.bf16.mxu1 %v3113_v9 }
 0xbcf   :  { %2654 = vmatpush3.bf16.msra.mxu1 %v3114_v62 }
 0xc84   :  { %v2071_v52 = vpop.f32.mrb[20].mxu1  ;;  %v2124_v53 = vpop.f32.mrb[28].mxu0 }
 0xc85   :  { %v2531_v25 = vmul.f32 -1.442695, %v2071_v52  ;;  %v2073_v6 = vpop.f32.mrb[21].mxu1  ;;  %v2126_v26 = vpop.f32.mrb[29].mxu0 }
 0xc86   :  { %v2532_v33 = vmul.f32 -1.442695, %v2073_v6  ;;  %v2075_v35 = vpop.f32.mrb[22].mxu1  ;;  %v2128_v54 = vpop.f32.mrb[30].mxu0 }
 0xc87   :  { %3195 = vpow2.f32 %v2531_v25  ;;  %v2533_v5 = vmul.f32 -1.442695, %v2075_v35  ;;  %v2077_v7 = vpop.f32.mrb[23].mxu1  ;;  %v2130_v56 = vpop.f32.mrb[31].mxu0 }
 0xc88   :  { %3197 = vpow2.f32 %v2532_v33  ;;  %v2534_v20 = vmul.f32 -1.442695, %v2077_v7 }
 0xc89   :  { %3199 = vpow2.f32 %v2533_v5 }
 0xc8a   :  { %3201 = vpow2.f32 %v2534_v20 }
 0xc8c   :  { %v2081_v55 = vpop.f32.mrb[24].mxu1  ;;  %v2134_v15 = vpop.f32.mrb[32].mxu0 }
 0xc8d   :  { %v2535_v14 = vmul.f32 -1.442695, %v2081_v55  ;;  %v2083_v8 = vpop.f32.mrb[25].mxu1  ;;  %v2136_v27 = vpop.f32.mrb[33].mxu0 }
 0xc8e   :  { %v2536_v10 = vmul.f32 -1.442695, %v2083_v8  ;;  %v2085_v57 = vpop.f32.mrb[26].mxu1  ;;  %v2138_v58 = vpop.f32.mrb[34].mxu0 }
 0xc8f   :  { %3203 = vpow2.f32 %v2535_v14  ;;  %v2537_v60 = vmul.f32 -1.442695, %v2085_v57  ;;  %v2087_v29 = vpop.f32.mrb[27].mxu1  ;;  %v2140_v3 = vpop.f32.mrb[35].mxu0 }
 0xc90   :  { %3205 = vpow2.f32 %v2536_v10  ;;  %v2538_v28 = vmul.f32 -1.442695, %v2087_v29 }
 0xc91   :  { %v3196_v59 = vpop.eup %3195  ;;  %3207 = vpow2.f32 %v2537_v60 }
 0xc92   :  { %v3198_v43 = vpop.eup %3197  ;;  %v2167_v42 = vadd.f32 1.0, %v3196_v59  ;;  %3209 = vpow2.f32 %v2538_v28 }
 0xc93   :  { %v3200_v24 = vpop.eup %3199  ;;  %v2168_v46 = vadd.f32 1.0, %v3198_v43 }
 0xc94   :  { %v3202_v16 = vpop.eup %3201  ;;  %3211 = vrcp.f32 %v2167_v42  ;;  %v2169_v17 = vadd.f32 1.0, %v3200_v24 }
 0xc95   :  { %3213 = vrcp.f32 %v2168_v46  ;;  %v2170_v44 = vadd.f32 1.0, %v3202_v16 }
 0xc96   :  { %3215 = vrcp.f32 %v2169_v17 }
 0xc97   :  { %3217 = vrcp.f32 %v2170_v44 }
 0xc99   :  { %v3204_v61 = vpop.eup %3203 }
 0xc9a   :  { %v3206_v11 = vpop.eup %3205  ;;  %v2171_v4 = vadd.f32 1.0, %v3204_v61 }
 0xc9b   :  { %v3208_v12 = vpop.eup %3207  ;;  %v2172_v1 = vadd.f32 1.0, %v3206_v11 }
 0xc9c   :  { %v3210_v13 = vpop.eup %3209  ;;  %3219 = vrcp.f32 %v2171_v4  ;;  %v2173_v21 = vadd.f32 1.0, %v3208_v12 }
 0xc9d   :  { %3221 = vrcp.f32 %v2172_v1  ;;  %v2174_v22 = vadd.f32 1.0, %v3210_v13 }
 0xc9e   :  { %v3212_v0 = vpop.eup %3211  ;;  %3223 = vrcp.f32 %v2173_v21 }
 0xc9f   :  { %v3214_v18 = vpop.eup %3213  ;;  %v2191_v23 = vmul.f32 %v3212_v0, %v2071_v52  ;;  %3225 = vrcp.f32 %v2174_v22 }
 0xca0   :  { %v3216_v31 = vpop.eup %3215  ;;  %v2192_v32 = vmul.f32 %v3214_v18, %v2073_v6 }
 0xca1   :  { %v3218_v34 = vpop.eup %3217  ;;  %v2199_v36 = vmul.f32 %v2191_v23, %v2124_v53  ;;  %v2193_v38 = vmul.f32 %v3216_v31, %v2075_v35 }
 0xca2   :  { %v2200_v39 = vmul.f32 %v2192_v32, %v2126_v26  ;;  %v2194_v40 = vmul.f32 %v3218_v34, %v2077_v7 }
 0xca3   :  { %v2201_v47 = vmul.f32 %v2193_v38, %v2128_v54 }
 0xca4   :  { %v2202_v48 = vmul.f32 %v2194_v40, %v2130_v56 }
 0xca5   :  { %v2207_v30 = vpack.c.bf16 %v2201_v47, %v2199_v36 }
 0xca6   :  { %v3220_v63 = vpop.eup %3219  ;;  %v2208_v49 = vpack.c.bf16 %v2202_v48, %v2200_v39 }
 0xca7   :  { %v3222_v50 = vpop.eup %3221  ;;  %v2195_v19 = vmul.f32 %v3220_v63, %v2081_v55 }
 0xca8   :  { %v3224_v51 = vpop.eup %3223  ;;  %v2196_v9 = vmul.f32 %v3222_v50, %v2083_v8  ;;  %2371 = vmatprep.mubr.bf16.mxu1 %v2208_v49 }
 0xca9   :  { %v3226_v62 = vpop.eup %3225  ;;  %v2203_v52 = vmul.f32 %v2195_v19, %v2134_v15  ;;  %v2197_v25 = vmul.f32 %v3224_v51, %v2085_v57  ;;  %2372 = vmatmul.mubr.bf16.vlgmr.msra.gmra.mrb[28].mxu1 %v2207_v30 }
 0xcaa   :  { %v2204_v6 = vmul.f32 %v2196_v9, %v2136_v27  ;;  %v2198_v33 = vmul.f32 %v3226_v62, %v2087_v29 }
 0xcab   :  { %v2205_v53 = vmul.f32 %v2197_v25, %v2138_v58 }
 0xcac   :  { %v2206_v35 = vmul.f32 %v2198_v33, %v2140_v3 }
 0xcad   :  { %v2209_v26 = vpack.c.bf16 %v2205_v53, %v2203_v52 }
 0xcae   :  { %v2210_v5 = vpack.c.bf16 %v2206_v35, %v2204_v6 }
 0xcb0   :  { %2379 = vmatprep.mubr.bf16.mxu1 %v2210_v5 }
 0xcb1   :  { %2380 = vmatmul.mubr.bf16.gmra.mrb[32].mxu1 %v2209_v26 }
 0xd7c   :  { %v2655_v54 = vpop.f32.mrb[28].mxu1 }
 0xd7d   :  { %v2656_v7 = vpop.f32.mrb[29].mxu1 }
 0xd7e   :  { %v2657_v56 = vadd.f32 %v2656_v7, %v2655_v54  ;;  %v2658_v20 = vpop.f32.mrb[30].mxu1 }
 0xd7f   :  { %v2659_v55 = vpop.f32.mrb[31].mxu1 }
 0xd80   :  { %v2388_v14 = vadd.f32 %v2657_v56, %v4041_v37  ;;  %v2660_v8 = vadd.f32 %v2659_v55, %v2658_v20 }
 0xd82   :  { %2392 = vst [vmem:[#allocation17] sm:$0xff] %v2388_v14  ;;  %v2389_v15 = vadd.f32 %v2660_v8, %v4045_v45 }
 0xd84   :  { %2393 = vst [vmem:[#allocation17 + $0x8] sm:$0xff] %v2389_v15  ;;  %v2661_v27 = vpop.f32.mrb[32].mxu1 }
 0xd85   :  { %v2662_v10 = vpop.f32.mrb[33].mxu1 }
 0xd86   :  { %v2663_v57 = vadd.f32 %v2662_v10, %v2661_v27  ;;  %v2664_v58 = vpop.f32.mrb[34].mxu1 }
 0xd87   :  { %v2665_v60 = vpop.f32.mrb[35].mxu1 }
 0xd88   :  { %v2390_v29 = vadd.f32 %v2663_v57, %v4043_v41  ;;  %v2666_v3 = vadd.f32 %v2665_v60, %v2664_v58 }
 0xd8a   :  { %2394 = vst [vmem:[#allocation17 + $0x10] sm:$0xff] %v2390_v29  ;;  %v2391_v28 = vadd.f32 %v2666_v3, %v4051_v2 }
 0xd8c   :  { %2395 = vst [vmem:[#allocation17 + $0x18] sm:$0xff] %v2391_v28 }
 0xd8d   :  { %3440 = shalt.err (!%p3437_p6)
}
 0xd8e   :  { %s3441_s4 = scalar_lea.hbm %s4096_s11, 512 }
 0xd8f   :  { %p3442_p7 = scmp.ne.s32.totalorder %s4096_s11, %s3441_s4  ;;  %p3445_p8 = scmp.lt.u32.totalorder %s3441_s4, %s4096_s11 }
 0xd91   :  { %p3447_p9 = pnand %p3445_p8, %p3442_p7 }
 0xd93   :  { %3450 = shalt.err (!%p3447_p9)
}
 0xd94   :  { %2407 = dma.vmem_to_hbm [thread:$0]  %s2402_s15, 512, %s4096_s11, [#allocation4], %s3465_s29, %s3465_s29, %s3466_s30  }
 0xd95   :  { %3461 = dma.done.wait [#allocation4], 512  }
 0xd96   :  { %3462 = vsyncadd [#allocation4], 4294966784 }
 0xd97   :  { %2411 = vsyncpa [#allocation3], 1 }
 0xd98   :  { %2412 = vsyncpa [#allocation6], 1 }
 0xd99   :  { %2413 = vsyncpa [#allocation9], 1 }
 0xd9a   :  { %2414 = vsyncpa [#allocation12], 1 }
 0xd9b   :  { %2415 = vsyncpa [#allocation15], 1 }
 0xd9c   :  { %2416 = vsyncpa [#allocation4], 1 }

</bundles_post_ra>
